<compile_context>
chip_gen: v6e
topology: v6e:2x2x1
jax: 0.10.0
libtpu: 0.0.40
codegen_flags: <defaults>
</compile_context>

<pallas_src>
import functools

import jax
import jax.numpy as jnp
from jax.experimental import pallas as pl
from jax.experimental.pallas import tpu as pltpu


# ----------------------------------------------------------------------------
# Fast path: whole bf16 weight stack resident in VMEM, one kernel invocation.
# ----------------------------------------------------------------------------
def _fused_resident_kernel(x_ref, w_ref, b_ref, o_ref):
    act = x_ref[...].astype(jnp.float32)
    num_layers = w_ref.shape[0]
    for l in range(num_layers):                       # static unroll (L=10)
        y = jnp.dot(act.astype(jnp.bfloat16), w_ref[l],
                    preferred_element_type=jnp.float32)
        act = jnp.maximum(y + b_ref[l].astype(jnp.float32), 0.0)
    o_ref[...] = act.astype(o_ref.dtype)


# ----------------------------------------------------------------------------
# Main path: grid=(L, NT); layer l streams its weight in NT column tiles.
# Activation ping-pongs between two VMEM slots, stored as NT chunks of width
# tn along K so that every ref access uses static (or leading-axis dynamic)
# indices only.
# ----------------------------------------------------------------------------
def _fused_tiled_kernel(x_ref, w_ref, b_ref, o_ref, act_ref, *, nt):
    l = pl.program_id(0)          # layer index (carry)
    j = pl.program_id(1)          # output-column tile index
    num_layers = pl.num_programs(0)
    m = x_ref.shape[0]
    tn = w_ref.shape[1]

    # First step: split the input x into K-chunks inside ping-pong slot 0.
    @pl.when(jnp.logical_and(l == 0, j == 0))
    def _():
        for i in range(nt):
            act_ref[0, i] = x_ref[:, i * tn:(i + 1) * tn].astype(jnp.float32)

    src = l % 2                    # slot holding this layer's input
    dst = 1 - src                  # slot receiving this layer's output

    # y[:, j-tile] = sum_i act_chunk_i @ W[i*tn:(i+1)*tn, j-tile]   (f32 acc)
    acc = jnp.zeros((m, tn), jnp.float32)
    for i in range(nt):            # static unroll over K chunks
        a = act_ref[src, i].astype(jnp.bfloat16)
        acc = acc + jnp.dot(a, w_ref[i * tn:(i + 1) * tn, :],
                            preferred_element_type=jnp.float32)
    y = jnp.maximum(acc + b_ref[l * nt + j].astype(jnp.float32), 0.0)

    @pl.when(l < num_layers - 1)
    def _():
        act_ref[dst, j] = y        # feed next layer (skip store on last layer)

    @pl.when(l == num_layers - 1)
    def _():
        o_ref[...] = y.astype(o_ref.dtype)


def fused_mlp_relu(x, w_stack, b_stack, *, tn=512,
                   resident_weight_bytes=4 * 1024 * 1024):
    """ReLU-chained MLP: x:[M,K], w_stack:[L,K,N] (bf16), b_stack:[L,1,N].

    Requires equal layer widths (K == N, true for the spec: all 5120)."""
    M, K = x.shape
    L, K2, N = w_stack.shape
    assert K == K2 and K == N, "fused kernel requires equal in/hidden/out widths"
    assert b_stack.shape == (L, 1, N)
    assert M % 8 == 0 and N % 128 == 0

    # Stream weights in bf16 (halves the dominant HBM weight traffic).
    w = w_stack if w_stack.dtype == jnp.bfloat16 else w_stack.astype(jnp.bfloat16)

    # --- Fast path: whole weight stack fits comfortably in VMEM. -------------
    if w.size * w.dtype.itemsize <= resident_weight_bytes:
        return pl.pallas_call(
            _fused_resident_kernel,
            out_shape=jax.ShapeDtypeStruct((M, N), x.dtype),
        )(x, w, b_stack)

    # --- Tiled path: grid over (layer, N-tile). ------------------------------
    tn = min(tn, N)
    assert N % tn == 0 and tn % 128 == 0, "tn must divide N and be 128-aligned"
    nt = N // tn

    # All biases resident in VMEM: one (1, tn) row per (layer, tile).
    b_tiles = b_stack.reshape(L * nt, 1, tn)

    kernel = functools.partial(_fused_tiled_kernel, nt=nt)

    grid_spec = pltpu.PrefetchScalarGridSpec(
        num_scalar_prefetch=0,
        grid=(L, nt),
        in_specs=[
            # x: constant block index -> DMA'd once.
            pl.BlockSpec((M, K), lambda l, j: (0, 0)),
            # per-(layer, tile) weight column block, pipeline double-buffered.
            pl.BlockSpec((None, K, tn), lambda l, j: (l, 0, j)),
            # full bias stack resident (constant block index).
            pl.BlockSpec((L * nt, 1, tn), lambda l, j: (0, 0, 0)),
        ],
        out_specs=pl.BlockSpec((M, tn), lambda l, j: (0, j)),
        scratch_shapes=[pltpu.VMEM((2, nt, M, tn), jnp.float32)],  # ping-pong act
    )

    return pl.pallas_call(
        kernel,
        out_shape=jax.ShapeDtypeStruct((M, N), x.dtype),
        grid_spec=grid_spec,
        compiler_params=pltpu.CompilerParams(
            dimension_semantics=("arbitrary", "arbitrary"),  # sequential carry
            vmem_limit_bytes=64 * 1024 * 1024,
        ),
    )(x, w, b_tiles)


# ----------------------------------------------------------------------------
# Parameter construction (PyTorch-style init), weights stored in bf16.
# ----------------------------------------------------------------------------
def make_test_model_params(key, in_features, hidden, out_features,
                           weight_dtype=jnp.bfloat16):
    """linear1, linear2[0:2], ..., linear5[0:2], linear6 -> 10 stacked layers."""
    dims = ([(in_features, hidden)]
            + [(hidden, hidden)] * 8
            + [(hidden, out_features)])
    keys = jax.random.split(key, len(dims))
    ws, bs = [], []
    for k, (fi, fo) in zip(keys, dims):
        kw, kb = jax.random.split(k)
        bound = 1.0 / (fi ** 0.5)
        ws.append(jax.random.uniform(kw, (fi, fo), jnp.float32, -bound, bound))
        bs.append(jax.random.uniform(kb, (fo,), jnp.float32, -bound, bound))
    w_stack = jnp.stack(ws).astype(weight_dtype)                # [10, K, N]
    b_stack = jnp.stack([b.reshape(1, -1) for b in bs])         # [10, 1, N] f32
    return w_stack, b_stack


def reference_forward(x, w_stack, b_stack):
    """Pure-JAX reference mirroring the kernel numerics (bf16 operands, f32 acc)."""
    act = x.astype(jnp.float32)
    for l in range(w_stack.shape[0]):
        y = jnp.dot(act.astype(jnp.bfloat16).astype(jnp.float32),
                    w_stack[l].astype(jnp.float32)) + b_stack[l]
        act = jnp.maximum(y, 0.0)
    return act


@jax.jit
def test_model_forward(x, w_stack, b_stack):
    """Forward of TestModel: ReLU after every layer, including the last."""
    return fused_mlp_relu(x, w_stack, b_stack)


if __name__ == "__main__":
    key = jax.random.PRNGKey(0)
    kx, kp = jax.random.split(key)
    batch = 8   # spec batch is [batch, 5120]; small widths used for the test

    # --- Path 1: small width -> resident-weight fast path ---------------------
    width = 256
    x = jax.random.normal(kx, (batch, width), jnp.float32)
    w_stack, b_stack = make_test_model_params(kp, width, width, width)
    out_small = jax.block_until_ready(test_model_forward(x, w_stack, b_stack))
    ref_small = reference_forward(x, w_stack, b_stack)
    assert out_small.shape == (batch, width) and out_small.dtype == jnp.float32
    assert bool(jnp.all(out_small >= 0.0))
    assert jnp.allclose(out_small, ref_small, atol=1e-3, rtol=1e-3)

    # --- Path 2: larger width -> layer-grid + N-tiled streaming path ----------
    width2 = 512
    x2 = jax.random.normal(kx, (batch, width2), jnp.float32)
    w2, b2 = make_test_model_params(kp, width2, width2, width2)
    tiled_fwd = jax.jit(functools.partial(fused_mlp_relu, tn=256,
                                          resident_weight_bytes=0))
    out_tiled = jax.block_until_ready(tiled_fwd(x2, w2, b2))
    ref_tiled = reference_forward(x2, w2, b2)
    assert out_tiled.shape == (batch, width2) and out_tiled.dtype == jnp.float32
    assert bool(jnp.all(out_tiled >= 0.0))
    assert jnp.allclose(out_tiled, ref_tiled, atol=1e-3, rtol=1e-3)

    print("KERNEL_OK")
</pallas_src>

<mosaic_0001>
module attributes {stable_mosaic.version = 11 : i64} {
  func.func @_fused_resident_kernel(%arg0: memref<8x256xf32, #tpu.memory_space<vmem>>, %arg1: memref<10x256x256xbf16, #tpu.memory_space<vmem>>, %arg2: memref<10x1x256xf32, #tpu.memory_space<vmem>>, %arg3: memref<8x256xf32, #tpu.memory_space<vmem>>) attributes {dimension_semantics = [], scalar_prefetch = 0 : i64, scratch_operands = 0 : i64, tpu.core_type = #tpu.core_type<tc>} {
    %c0 = arith.constant 0 : index
    %c0_0 = arith.constant 0 : index
    %0 = vector.load %arg0[%c0, %c0_0] : memref<8x256xf32, #tpu.memory_space<vmem>>, vector<8x256xf32>
    %1 = arith.truncf %0 : vector<8x256xf32> to vector<8x256xbf16>
    %c0_1 = arith.constant 0 : index
    %c0_2 = arith.constant 0 : index
    %c0_3 = arith.constant 0 : index
    %2 = vector.load %arg1[%c0_1, %c0_2, %c0_3] : memref<10x256x256xbf16, #tpu.memory_space<vmem>>, vector<1x256x256xbf16>
    %3 = vector.shape_cast %2 : vector<1x256x256xbf16> to vector<256x256xbf16>
    %cst = arith.constant dense<0.000000e+00> : vector<8x256xf32>
    %4 = tpu.matmul %1, %3, %cst {dimension_numbers = #tpu.dot_dimension_numbers<[1], [0], [0], [1], [0, 0, 1, 1], [], []>} : vector<8x256xbf16>, vector<256x256xbf16>, vector<8x256xf32> -> vector<8x256xf32>
    %c0_4 = arith.constant 0 : index
    %c0_5 = arith.constant 0 : index
    %c0_6 = arith.constant 0 : index
    %5 = vector.load %arg2[%c0_4, %c0_5, %c0_6] : memref<10x1x256xf32, #tpu.memory_space<vmem>>, vector<1x1x256xf32>
    %6 = vector.shape_cast %5 : vector<1x1x256xf32> to vector<1x256xf32>
    %7 = vector.broadcast %6 : vector<1x256xf32> to vector<8x256xf32>
    %8 = arith.addf %4, %7 : vector<8x256xf32>
    %cst_7 = arith.constant 0.000000e+00 : f32
    %9 = vector.broadcast %cst_7 : f32 to vector<8x256xf32>
    %10 = arith.maximumf %8, %9 : vector<8x256xf32>
    %11 = arith.truncf %10 : vector<8x256xf32> to vector<8x256xbf16>
    %c1 = arith.constant 1 : index
    %c0_8 = arith.constant 0 : index
    %c0_9 = arith.constant 0 : index
    %12 = vector.load %arg1[%c1, %c0_8, %c0_9] : memref<10x256x256xbf16, #tpu.memory_space<vmem>>, vector<1x256x256xbf16>
    %13 = vector.shape_cast %12 : vector<1x256x256xbf16> to vector<256x256xbf16>
    %cst_10 = arith.constant dense<0.000000e+00> : vector<8x256xf32>
    %14 = tpu.matmul %11, %13, %cst_10 {dimension_numbers = #tpu.dot_dimension_numbers<[1], [0], [0], [1], [0, 0, 1, 1], [], []>} : vector<8x256xbf16>, vector<256x256xbf16>, vector<8x256xf32> -> vector<8x256xf32>
    %c1_11 = arith.constant 1 : index
    %c0_12 = arith.constant 0 : index
    %c0_13 = arith.constant 0 : index
    %15 = vector.load %arg2[%c1_11, %c0_12, %c0_13] : memref<10x1x256xf32, #tpu.memory_space<vmem>>, vector<1x1x256xf32>
    %16 = vector.shape_cast %15 : vector<1x1x256xf32> to vector<1x256xf32>
    %17 = vector.broadcast %16 : vector<1x256xf32> to vector<8x256xf32>
    %18 = arith.addf %14, %17 : vector<8x256xf32>
    %cst_14 = arith.constant 0.000000e+00 : f32
    %19 = vector.broadcast %cst_14 : f32 to vector<8x256xf32>
    %20 = arith.maximumf %18, %19 : vector<8x256xf32>
    %21 = arith.truncf %20 : vector<8x256xf32> to vector<8x256xbf16>
    %c2 = arith.constant 2 : index
    %c0_15 = arith.constant 0 : index
    %c0_16 = arith.constant 0 : index
    %22 = vector.load %arg1[%c2, %c0_15, %c0_16] : memref<10x256x256xbf16, #tpu.memory_space<vmem>>, vector<1x256x256xbf16>
    %23 = vector.shape_cast %22 : vector<1x256x256xbf16> to vector<256x256xbf16>
    %cst_17 = arith.constant dense<0.000000e+00> : vector<8x256xf32>
    %24 = tpu.matmul %21, %23, %cst_17 {dimension_numbers = #tpu.dot_dimension_numbers<[1], [0], [0], [1], [0, 0, 1, 1], [], []>} : vector<8x256xbf16>, vector<256x256xbf16>, vector<8x256xf32> -> vector<8x256xf32>
    %c2_18 = arith.constant 2 : index
    %c0_19 = arith.constant 0 : index
    %c0_20 = arith.constant 0 : index
    %25 = vector.load %arg2[%c2_18, %c0_19, %c0_20] : memref<10x1x256xf32, #tpu.memory_space<vmem>>, vector<1x1x256xf32>
    %26 = vector.shape_cast %25 : vector<1x1x256xf32> to vector<1x256xf32>
    %27 = vector.broadcast %26 : vector<1x256xf32> to vector<8x256xf32>
    %28 = arith.addf %24, %27 : vector<8x256xf32>
    %cst_21 = arith.constant 0.000000e+00 : f32
    %29 = vector.broadcast %cst_21 : f32 to vector<8x256xf32>
    %30 = arith.maximumf %28, %29 : vector<8x256xf32>
    %31 = arith.truncf %30 : vector<8x256xf32> to vector<8x256xbf16>
    %c3 = arith.constant 3 : index
    %c0_22 = arith.constant 0 : index
    %c0_23 = arith.constant 0 : index
    %32 = vector.load %arg1[%c3, %c0_22, %c0_23] : memref<10x256x256xbf16, #tpu.memory_space<vmem>>, vector<1x256x256xbf16>
    %33 = vector.shape_cast %32 : vector<1x256x256xbf16> to vector<256x256xbf16>
    %cst_24 = arith.constant dense<0.000000e+00> : vector<8x256xf32>
    %34 = tpu.matmul %31, %33, %cst_24 {dimension_numbers = #tpu.dot_dimension_numbers<[1], [0], [0], [1], [0, 0, 1, 1], [], []>} : vector<8x256xbf16>, vector<256x256xbf16>, vector<8x256xf32> -> vector<8x256xf32>
    %c3_25 = arith.constant 3 : index
    %c0_26 = arith.constant 0 : index
    %c0_27 = arith.constant 0 : index
    %35 = vector.load %arg2[%c3_25, %c0_26, %c0_27] : memref<10x1x256xf32, #tpu.memory_space<vmem>>, vector<1x1x256xf32>
    %36 = vector.shape_cast %35 : vector<1x1x256xf32> to vector<1x256xf32>
    %37 = vector.broadcast %36 : vector<1x256xf32> to vector<8x256xf32>
    %38 = arith.addf %34, %37 : vector<8x256xf32>
    %cst_28 = arith.constant 0.000000e+00 : f32
    %39 = vector.broadcast %cst_28 : f32 to vector<8x256xf32>
    %40 = arith.maximumf %38, %39 : vector<8x256xf32>
    %41 = arith.truncf %40 : vector<8x256xf32> to vector<8x256xbf16>
    %c4 = arith.constant 4 : index
    %c0_29 = arith.constant 0 : index
    %c0_30 = arith.constant 0 : index
    %42 = vector.load %arg1[%c4, %c0_29, %c0_30] : memref<10x256x256xbf16, #tpu.memory_space<vmem>>, vector<1x256x256xbf16>
    %43 = vector.shape_cast %42 : vector<1x256x256xbf16> to vector<256x256xbf16>
    %cst_31 = arith.constant dense<0.000000e+00> : vector<8x256xf32>
    %44 = tpu.matmul %41, %43, %cst_31 {dimension_numbers = #tpu.dot_dimension_numbers<[1], [0], [0], [1], [0, 0, 1, 1], [], []>} : vector<8x256xbf16>, vector<256x256xbf16>, vector<8x256xf32> -> vector<8x256xf32>
    %c4_32 = arith.constant 4 : index
    %c0_33 = arith.constant 0 : index
    %c0_34 = arith.constant 0 : index
    %45 = vector.load %arg2[%c4_32, %c0_33, %c0_34] : memref<10x1x256xf32, #tpu.memory_space<vmem>>, vector<1x1x256xf32>
    %46 = vector.shape_cast %45 : vector<1x1x256xf32> to vector<1x256xf32>
    %47 = vector.broadcast %46 : vector<1x256xf32> to vector<8x256xf32>
    %48 = arith.addf %44, %47 : vector<8x256xf32>
    %cst_35 = arith.constant 0.000000e+00 : f32
    %49 = vector.broadcast %cst_35 : f32 to vector<8x256xf32>
    %50 = arith.maximumf %48, %49 : vector<8x256xf32>
    %51 = arith.truncf %50 : vector<8x256xf32> to vector<8x256xbf16>
    %c5 = arith.constant 5 : index
    %c0_36 = arith.constant 0 : index
    %c0_37 = arith.constant 0 : index
    %52 = vector.load %arg1[%c5, %c0_36, %c0_37] : memref<10x256x256xbf16, #tpu.memory_space<vmem>>, vector<1x256x256xbf16>
    %53 = vector.shape_cast %52 : vector<1x256x256xbf16> to vector<256x256xbf16>
    %cst_38 = arith.constant dense<0.000000e+00> : vector<8x256xf32>
    %54 = tpu.matmul %51, %53, %cst_38 {dimension_numbers = #tpu.dot_dimension_numbers<[1], [0], [0], [1], [0, 0, 1, 1], [], []>} : vector<8x256xbf16>, vector<256x256xbf16>, vector<8x256xf32> -> vector<8x256xf32>
    %c5_39 = arith.constant 5 : index
    %c0_40 = arith.constant 0 : index
    %c0_41 = arith.constant 0 : index
    %55 = vector.load %arg2[%c5_39, %c0_40, %c0_41] : memref<10x1x256xf32, #tpu.memory_space<vmem>>, vector<1x1x256xf32>
    %56 = vector.shape_cast %55 : vector<1x1x256xf32> to vector<1x256xf32>
    %57 = vector.broadcast %56 : vector<1x256xf32> to vector<8x256xf32>
    %58 = arith.addf %54, %57 : vector<8x256xf32>
    %cst_42 = arith.constant 0.000000e+00 : f32
    %59 = vector.broadcast %cst_42 : f32 to vector<8x256xf32>
    %60 = arith.maximumf %58, %59 : vector<8x256xf32>
    %61 = arith.truncf %60 : vector<8x256xf32> to vector<8x256xbf16>
    %c6 = arith.constant 6 : index
    %c0_43 = arith.constant 0 : index
    %c0_44 = arith.constant 0 : index
    %62 = vector.load %arg1[%c6, %c0_43, %c0_44] : memref<10x256x256xbf16, #tpu.memory_space<vmem>>, vector<1x256x256xbf16>
    %63 = vector.shape_cast %62 : vector<1x256x256xbf16> to vector<256x256xbf16>
    %cst_45 = arith.constant dense<0.000000e+00> : vector<8x256xf32>
    %64 = tpu.matmul %61, %63, %cst_45 {dimension_numbers = #tpu.dot_dimension_numbers<[1], [0], [0], [1], [0, 0, 1, 1], [], []>} : vector<8x256xbf16>, vector<256x256xbf16>, vector<8x256xf32> -> vector<8x256xf32>
    %c6_46 = arith.constant 6 : index
    %c0_47 = arith.constant 0 : index
    %c0_48 = arith.constant 0 : index
    %65 = vector.load %arg2[%c6_46, %c0_47, %c0_48] : memref<10x1x256xf32, #tpu.memory_space<vmem>>, vector<1x1x256xf32>
    %66 = vector.shape_cast %65 : vector<1x1x256xf32> to vector<1x256xf32>
    %67 = vector.broadcast %66 : vector<1x256xf32> to vector<8x256xf32>
    %68 = arith.addf %64, %67 : vector<8x256xf32>
    %cst_49 = arith.constant 0.000000e+00 : f32
    %69 = vector.broadcast %cst_49 : f32 to vector<8x256xf32>
    %70 = arith.maximumf %68, %69 : vector<8x256xf32>
    %71 = arith.truncf %70 : vector<8x256xf32> to vector<8x256xbf16>
    %c7 = arith.constant 7 : index
    %c0_50 = arith.constant 0 : index
    %c0_51 = arith.constant 0 : index
    %72 = vector.load %arg1[%c7, %c0_50, %c0_51] : memref<10x256x256xbf16, #tpu.memory_space<vmem>>, vector<1x256x256xbf16>
    %73 = vector.shape_cast %72 : vector<1x256x256xbf16> to vector<256x256xbf16>
    %cst_52 = arith.constant dense<0.000000e+00> : vector<8x256xf32>
    %74 = tpu.matmul %71, %73, %cst_52 {dimension_numbers = #tpu.dot_dimension_numbers<[1], [0], [0], [1], [0, 0, 1, 1], [], []>} : vector<8x256xbf16>, vector<256x256xbf16>, vector<8x256xf32> -> vector<8x256xf32>
    %c7_53 = arith.constant 7 : index
    %c0_54 = arith.constant 0 : index
    %c0_55 = arith.constant 0 : index
    %75 = vector.load %arg2[%c7_53, %c0_54, %c0_55] : memref<10x1x256xf32, #tpu.memory_space<vmem>>, vector<1x1x256xf32>
    %76 = vector.shape_cast %75 : vector<1x1x256xf32> to vector<1x256xf32>
    %77 = vector.broadcast %76 : vector<1x256xf32> to vector<8x256xf32>
    %78 = arith.addf %74, %77 : vector<8x256xf32>
    %cst_56 = arith.constant 0.000000e+00 : f32
    %79 = vector.broadcast %cst_56 : f32 to vector<8x256xf32>
    %80 = arith.maximumf %78, %79 : vector<8x256xf32>
    %81 = arith.truncf %80 : vector<8x256xf32> to vector<8x256xbf16>
    %c8 = arith.constant 8 : index
    %c0_57 = arith.constant 0 : index
    %c0_58 = arith.constant 0 : index
    %82 = vector.load %arg1[%c8, %c0_57, %c0_58] : memref<10x256x256xbf16, #tpu.memory_space<vmem>>, vector<1x256x256xbf16>
    %83 = vector.shape_cast %82 : vector<1x256x256xbf16> to vector<256x256xbf16>
    %cst_59 = arith.constant dense<0.000000e+00> : vector<8x256xf32>
    %84 = tpu.matmul %81, %83, %cst_59 {dimension_numbers = #tpu.dot_dimension_numbers<[1], [0], [0], [1], [0, 0, 1, 1], [], []>} : vector<8x256xbf16>, vector<256x256xbf16>, vector<8x256xf32> -> vector<8x256xf32>
    %c8_60 = arith.constant 8 : index
    %c0_61 = arith.constant 0 : index
    %c0_62 = arith.constant 0 : index
    %85 = vector.load %arg2[%c8_60, %c0_61, %c0_62] : memref<10x1x256xf32, #tpu.memory_space<vmem>>, vector<1x1x256xf32>
    %86 = vector.shape_cast %85 : vector<1x1x256xf32> to vector<1x256xf32>
    %87 = vector.broadcast %86 : vector<1x256xf32> to vector<8x256xf32>
    %88 = arith.addf %84, %87 : vector<8x256xf32>
    %cst_63 = arith.constant 0.000000e+00 : f32
    %89 = vector.broadcast %cst_63 : f32 to vector<8x256xf32>
    %90 = arith.maximumf %88, %89 : vector<8x256xf32>
    %91 = arith.truncf %90 : vector<8x256xf32> to vector<8x256xbf16>
    %c9 = arith.constant 9 : index
    %c0_64 = arith.constant 0 : index
    %c0_65 = arith.constant 0 : index
    %92 = vector.load %arg1[%c9, %c0_64, %c0_65] : memref<10x256x256xbf16, #tpu.memory_space<vmem>>, vector<1x256x256xbf16>
    %93 = vector.shape_cast %92 : vector<1x256x256xbf16> to vector<256x256xbf16>
    %cst_66 = arith.constant dense<0.000000e+00> : vector<8x256xf32>
    %94 = tpu.matmul %91, %93, %cst_66 {dimension_numbers = #tpu.dot_dimension_numbers<[1], [0], [0], [1], [0, 0, 1, 1], [], []>} : vector<8x256xbf16>, vector<256x256xbf16>, vector<8x256xf32> -> vector<8x256xf32>
    %c9_67 = arith.constant 9 : index
    %c0_68 = arith.constant 0 : index
    %c0_69 = arith.constant 0 : index
    %95 = vector.load %arg2[%c9_67, %c0_68, %c0_69] : memref<10x1x256xf32, #tpu.memory_space<vmem>>, vector<1x1x256xf32>
    %96 = vector.shape_cast %95 : vector<1x1x256xf32> to vector<1x256xf32>
    %97 = vector.broadcast %96 : vector<1x256xf32> to vector<8x256xf32>
    %98 = arith.addf %94, %97 : vector<8x256xf32>
    %cst_70 = arith.constant 0.000000e+00 : f32
    %99 = vector.broadcast %cst_70 : f32 to vector<8x256xf32>
    %100 = arith.maximumf %98, %99 : vector<8x256xf32>
    %c0_71 = arith.constant 0 : index
    %c0_72 = arith.constant 0 : index
    %101 = vector.load %arg3[%c0_71, %c0_72] : memref<8x256xf32, #tpu.memory_space<vmem>>, vector<8x256xf32>
    tpu.vector_store %arg3[%c0_71, %c0_72], %100 {strides = array<i32>} : memref<8x256xf32, #tpu.memory_space<vmem>>, vector<8x256xf32>,
    return
  }
}

</mosaic_0001>

<bundles_post_ra>
// kernel: test_model_forward.1
= control target key start
LH: loop header
LB: loop body
LE: loop exit
PB: predicated region body
PF: predicated region fallthrough
CT: control target
= control target key end

     0   :  { %8 = vsyncpa [#allocation3], 0  ;;  %s3540_s0 = inlined_call_operand.hbm [shape: f32[8,256], index: 0, kind: input, shape index: {}]   ;;  %s3541_s1 = inlined_call_operand.hbm [shape: bf16[10,256,256], index: 1, kind: input, shape index: {}]   ;;  %s3542_s2 = inlined_call_operand.hbm [shape: f32[10,1,256], index: 2, kind: input, shape index: {}]   ;;  %s3543_s3 = inlined_call_operand.hbm [shape: f32[8,256], index: 3, kind: output, shape index: {}]  }
   0x1   :  { %9 = vsyncpa [#allocation6], 0 }
   0x2   :  { %10 = vsyncpa [#allocation4], 0  ;;  %s3476_s12 = smov [#allocation5]  }
   0x3   :  { %s26_s13 = sshll.u32 %s3476_s12, 4  ;;  %s27_s13 = int_to_ptr.vmem [resolvable:$true] %s26_s13 }
   0x4   :  { %s3398_s14 = scalar_lea.vmem %s27_s13, 40960  ;;  %p3403_p1 = scmp.lt.s32.totalorder %s27_s13, %s27_s13 }
   0x5   :  { %p3399_p0 = scmp.ne.s32.totalorder %s27_s13, %s3398_s14  ;;  %p3404_p2 = scmp.lt.s32.totalorder %s3398_s14, %s3398_s14 }
   0x7   :  { %p3405_p3 = por %p3404_p2, %p3403_p1 }
   0x9   :  { %p3406_p4 = pnand %p3405_p3, %p3399_p0 }
   0xb   :  { %3409 = shalt.err (!%p3406_p4)
}
   0xc   :  { %s3477_s15 = smov 128   ;;  %s3478_s16 = smov 8  }
   0xd   :  { %32 = dma.hbm_to_vmem [thread:$0]  %s3541_s1, 40960, %s27_s13, [#allocation6], %s3477_s15, %s3477_s15, %s3478_s16  }
   0xe   :  { %s3479_s19 = smov [#allocation2]   ;;  %s3480_s21 = smov [#allocation7]  }
   0xf   :  { %s17_s20 = sshll.u32 %s3479_s19, 4  ;;  %s38_s22 = sshll.u32 %s3480_s21, 4  ;;  %s18_s20 = int_to_ptr.vmem [resolvable:$true] %s17_s20  ;;  %s39_s22 = int_to_ptr.vmem [resolvable:$true] %s38_s22 }
  0x10   :  { %s3418_s23 = scalar_lea.vmem %s18_s20, 256  ;;  %p3423_p6 = scmp.lt.s32.totalorder %s18_s20, %s18_s20 }
  0x11   :  { %p3419_p5 = scmp.ne.s32.totalorder %s18_s20, %s3418_s23  ;;  %p3424_p7 = scmp.lt.s32.totalorder %s3418_s23, %s3418_s23 }
  0x13   :  { %p3425_p8 = por %p3424_p7, %p3423_p6 }
  0x15   :  { %p3426_p9 = pnand %p3425_p8, %p3419_p5 }
  0x17   :  { %3429 = shalt.err (!%p3426_p9)
}
  0x18   :  { %20 = dma.hbm_to_vmem [thread:$0]  %s3540_s0, 256, %s18_s20, [#allocation3]  }
  0x19   :  { %s3438_s26 = scalar_lea.vmem %s39_s22, 320  ;;  %p3443_p11 = scmp.lt.s32.totalorder %s39_s22, %s39_s22 }
  0x1a   :  { %p3439_p10 = scmp.ne.s32.totalorder %s39_s22, %s3438_s26  ;;  %p3444_p12 = scmp.lt.s32.totalorder %s3438_s26, %s3438_s26 }
  0x1c   :  { %p3445_p13 = por %p3444_p12, %p3443_p11 }
  0x1e   :  { %p3446_p0 = pnand %p3445_p13, %p3439_p10 }
  0x20   :  { %3449 = shalt.err (!%p3446_p0)
}
  0x21   :  { %s3481_s1 = smov 32   ;;  %s3482_s27 = smov 2  }
  0x22   :  { %44 = dma.hbm_to_vmem [thread:$0]  %s3542_s2, 320, %s39_s22, [#allocation6], %s3481_s1, %s3481_s1, %s3482_s27  }
  0x23   :  { %3470 = dma.done.wait [#allocation3], 256  }
  0x24   :  { %3471 = vsyncadd [#allocation3], 4294967040 }
  0x25   :  { %3472 = dma.done.wait [#allocation6], 41280  }
  0x26   :  { %3473 = vsyncadd [#allocation6], 4294926016  ;;  %v2910_v0 = vld [vmem:[#allocation5 + $0x74] ss:$8 sps:$4 sm:$0xff]   ;;  %v2912_v1 = vld [vmem:[#allocation5 + $0x70] ss:$8 sps:$4 sm:$0xff]  }
  0x27   :  { %262 = vmatprep.subr.bf16.mxu0 %v2910_v0  ;;  %v2913_v2 = vld [vmem:[#allocation5 + $0x64] ss:$8 sps:$4 sm:$0xff]   ;;  %v2915_v3 = vld [vmem:[#allocation5 + $0x60] ss:$8 sps:$4 sm:$0xff]   ;;  %v2916_v4 = vld [vmem:[#allocation5 + $0x54] ss:$8 sps:$4 sm:$0xff]  }
  0x28   :  { %263 = vmatpush1.bf16.msra.mxu0 %v2912_v1  ;;  %v2918_v5 = vld [vmem:[#allocation5 + $0x50] ss:$8 sps:$4 sm:$0xff]   ;;  %v2919_v6 = vld [vmem:[#allocation5 + $0x44] ss:$8 sps:$4 sm:$0xff]   ;;  %v2921_v7 = vld [vmem:[#allocation5 + $0x40] ss:$8 sps:$4 sm:$0xff]  }
  0x29   :  { %264 = vmatprep.subr.bf16.mxu0 %v2913_v2  ;;  %v2922_v8 = vld [vmem:[#allocation5 + $0x34] ss:$8 sps:$4 sm:$0xff]   ;;  %v2924_v9 = vld [vmem:[#allocation5 + $0x30] ss:$8 sps:$4 sm:$0xff]   ;;  %v2925_v10 = vld [vmem:[#allocation5 + $0x24] ss:$8 sps:$4 sm:$0xff]  }
  0x2a   :  { %v2927_v11 = vld [vmem:[#allocation5 + $0x20] ss:$8 sps:$4 sm:$0xff]   ;;  %v2928_v12 = vld [vmem:[#allocation5 + $0x14] ss:$8 sps:$4 sm:$0xff]   ;;  %v2930_v13 = vld [vmem:[#allocation5 + $0x10] ss:$8 sps:$4 sm:$0xff]  }
  0x2b   :  { %v55_v14 = vld [vmem:[#allocation2 + $0x8] sm:$0xff]  ;;  %v2931_v18 = vld [vmem:[#allocation5 + $0x4] ss:$8 sps:$4 sm:$0xff]   ;;  %v2933_v20 = vld [vmem:[#allocation5] ss:$8 sps:$4 sm:$0xff]   ;;  %s3483_s0 = smov [#allocation8]  }
  0x2c   :  { %265 = vmatpush1.bf16.msra.mxu0 %v2915_v3  ;;  %v57_v15 = vpack.c.bf16 %v55_v14, %v55_v14  ;;  %v2958_v16 = vld [vmem:[#allocation5 + $0x174] ss:$8 sps:$4 sm:$0xff]   ;;  %v2960_v17 = vld [vmem:[#allocation5 + $0x170] ss:$8 sps:$4 sm:$0xff]   ;;  %v2961_v19 = vld [vmem:[#allocation5 + $0x164] ss:$8 sps:$4 sm:$0xff]  }
  0x2d   :  { %266 = vmatprep.subr.bf16.mxu0 %v2916_v4  ;;  %513 = vmatprep.subr.bf16.mxu1 %v2958_v16  ;;  %v2963_v21 = vld [vmem:[#allocation5 + $0x160] ss:$8 sps:$4 sm:$0xff]   ;;  %v2964_v22 = vld [vmem:[#allocation5 + $0x154] ss:$8 sps:$4 sm:$0xff]   ;;  %v2936_v24 = vld [vmem:[#allocation5 + $0xf0] ss:$8 sps:$4 sm:$0xff]  }
  0x2e   :  { %294 = vmatprep.mubr.bf16.mxu0 %v57_v15  ;;  %514 = vmatpush1.bf16.msra.mxu1 %v2960_v17  ;;  %v2934_v23 = vld [vmem:[#allocation5 + $0xf4] ss:$8 sps:$4 sm:$0xff]   ;;  %v2966_v25 = vld [vmem:[#allocation5 + $0x150] ss:$8 sps:$4 sm:$0xff]   ;;  %v2967_v26 = vld [vmem:[#allocation5 + $0x144] ss:$8 sps:$4 sm:$0xff]  }
  0x2f   :  { %515 = vmatprep.subr.bf16.mxu1 %v2961_v19  ;;  %v2937_v27 = vld [vmem:[#allocation5 + $0xe4] ss:$8 sps:$4 sm:$0xff]   ;;  %v2939_v28 = vld [vmem:[#allocation5 + $0xe0] ss:$8 sps:$4 sm:$0xff]   ;;  %v2970_v30 = vld [vmem:[#allocation5 + $0x134] ss:$8 sps:$4 sm:$0xff]  }
  0x30   :  { %267 = vmatpush1.bf16.msra.mxu0 %v2918_v5  ;;  %v2969_v29 = vld [vmem:[#allocation5 + $0x140] ss:$8 sps:$4 sm:$0xff]   ;;  %v2940_v31 = vld [vmem:[#allocation5 + $0xd4] ss:$8 sps:$4 sm:$0xff]   ;;  %v2942_v32 = vld [vmem:[#allocation5 + $0xd0] ss:$8 sps:$4 sm:$0xff]  }
  0x31   :  { %268 = vmatprep.subr.bf16.mxu0 %v2919_v6  ;;  %v2972_v33 = vld [vmem:[#allocation5 + $0x130] ss:$8 sps:$4 sm:$0xff]   ;;  %v2973_v34 = vld [vmem:[#allocation5 + $0x124] ss:$8 sps:$4 sm:$0xff]   ;;  %v2975_v36 = vld [vmem:[#allocation5 + $0x120] ss:$8 sps:$4 sm:$0xff]  }
  0x32   :  { %516 = vmatpush1.bf16.msra.mxu1 %v2963_v21  ;;  %v2943_v35 = vld [vmem:[#allocation5 + $0xc4] ss:$8 sps:$4 sm:$0xff]   ;;  %v2945_v37 = vld [vmem:[#allocation5 + $0xc0] ss:$8 sps:$4 sm:$0xff]   ;;  %v2976_v38 = vld [vmem:[#allocation5 + $0x114] ss:$8 sps:$4 sm:$0xff]  }
  0x33   :  { %517 = vmatprep.subr.bf16.mxu1 %v2964_v22  ;;  %v2946_v39 = vld [vmem:[#allocation5 + $0xb4] ss:$8 sps:$4 sm:$0xff]   ;;  %v2978_v40 = vld [vmem:[#allocation5 + $0x110] ss:$8 sps:$4 sm:$0xff]   ;;  %v2979_v42 = vld [vmem:[#allocation5 + $0x104] ss:$8 sps:$4 sm:$0xff]  }
  0x34   :  { %269 = vmatpush1.bf16.msra.mxu0 %v2921_v7  ;;  %v2948_v41 = vld [vmem:[#allocation5 + $0xb0] ss:$8 sps:$4 sm:$0xff]   ;;  %v2949_v43 = vld [vmem:[#allocation5 + $0xa4] ss:$8 sps:$4 sm:$0xff]   ;;  %v2981_v44 = vld [vmem:[#allocation5 + $0x100] ss:$8 sps:$4 sm:$0xff]  }
  0x35   :  { %270 = vmatprep.subr.bf16.mxu0 %v2922_v8  ;;  %v2951_v45 = vld [vmem:[#allocation5 + $0xa0] ss:$8 sps:$4 sm:$0xff]   ;;  %v2982_v46 = vld [vmem:[#allocation5 + $0x1f4] ss:$8 sps:$4 sm:$0xff]   ;;  %v2984_v48 = vld [vmem:[#allocation5 + $0x1f0] ss:$8 sps:$4 sm:$0xff]  }
  0x36   :  { %518 = vmatpush1.bf16.msra.mxu1 %v2966_v25  ;;  %v2952_v47 = vld [vmem:[#allocation5 + $0x94] ss:$8 sps:$4 sm:$0xff]   ;;  %v2954_v49 = vld [vmem:[#allocation5 + $0x90] ss:$8 sps:$4 sm:$0xff]   ;;  %v2985_v50 = vld [vmem:[#allocation5 + $0x1e4] ss:$8 sps:$4 sm:$0xff]  }
  0x37   :  { %519 = vmatprep.subr.bf16.mxu1 %v2967_v26  ;;  %v2955_v51 = vld [vmem:[#allocation5 + $0x84] ss:$8 sps:$4 sm:$0xff]   ;;  %v2987_v52 = vld [vmem:[#allocation5 + $0x1e0] ss:$8 sps:$4 sm:$0xff]   ;;  %v54_v54 = vld [vmem:[#allocation2] sm:$0xff]  ;;  %s2572_s2 = sshll.u32 %s3483_s0, 4  ;;  %s2573_s2 = int_to_ptr.vmem [resolvable:$true] %s2572_s2 }
  0x38   :  { %271 = vmatpush1.bf16.msra.mxu0 %v2924_v9  ;;  %v2957_v53 = vld [vmem:[#allocation5 + $0x80] ss:$8 sps:$4 sm:$0xff]   ;;  %v2988_v55 = vld [vmem:[#allocation5 + $0x1d4] ss:$8 sps:$4 sm:$0xff]   ;;  %v2990_v56 = vld [vmem:[#allocation5 + $0x1d0] ss:$8 sps:$4 sm:$0xff]   ;;  %v56_v58 = vpack.c.bf16 %v54_v54, %v54_v54  ;;  %p3455_p2 = scmp.lt.s32.totalorder %s2573_s2, %s2573_s2 }
  0x39   :  { %272 = vmatprep.subr.bf16.mxu0 %v2925_v10  ;;  %v2991_v57 = vld [vmem:[#allocation5 + $0x1c4] ss:$8 sps:$4 sm:$0xff]   ;;  %v2993_v59 = vld [vmem:[#allocation5 + $0x1c0] ss:$8 sps:$4 sm:$0xff]   ;;  %v2994_v60 = vld [vmem:[#allocation5 + $0x1b4] ss:$8 sps:$4 sm:$0xff]  }
  0x3a   :  { %520 = vmatpush1.bf16.msra.mxu1 %v2969_v29  ;;  %v2996_v61 = vld [vmem:[#allocation5 + $0x1b0] ss:$8 sps:$4 sm:$0xff]   ;;  %v2997_v62 = vld [vmem:[#allocation5 + $0x1a4] ss:$8 sps:$4 sm:$0xff]   ;;  %v2999_v63 = vld [vmem:[#allocation5 + $0x1a0] ss:$8 sps:$4 sm:$0xff]  }
  0x3b   :  { %521 = vmatprep.subr.bf16.mxu1 %v2970_v30  ;;  %v3000_v0 = vld [vmem:[#allocation5 + $0x194] ss:$8 sps:$4 sm:$0xff]   ;;  %v3002_v1 = vld [vmem:[#allocation5 + $0x190] ss:$8 sps:$4 sm:$0xff]   ;;  %v3003_v2 = vld [vmem:[#allocation5 + $0x184] ss:$8 sps:$4 sm:$0xff]  }
  0x3c   :  { %273 = vmatpush1.bf16.msra.mxu0 %v2927_v11  ;;  %v3005_v3 = vld [vmem:[#allocation5 + $0x180] ss:$8 sps:$4 sm:$0xff]   ;;  %v3006_v4 = vld [vmem:[#allocation5 + $0x270] ss:$8 sps:$4 sm:$0xff]   ;;  %v3008_v5 = vld [vmem:[#allocation5 + $0x274] ss:$8 sps:$4 sm:$0xff]  }
  0x3d   :  { %274 = vmatprep.subr.bf16.mxu0 %v2928_v12  ;;  %v3011_v6 = vld [vmem:[#allocation5 + $0x264] ss:$8 sps:$4 sm:$0xff]   ;;  %v3009_v7 = vld [vmem:[#allocation5 + $0x260] ss:$8 sps:$4 sm:$0xff]   ;;  %v3014_v8 = vld [vmem:[#allocation5 + $0x254] ss:$8 sps:$4 sm:$0xff]  }
  0x3e   :  { %522 = vmatpush1.bf16.msra.mxu1 %v2972_v33  ;;  %v3012_v9 = vld [vmem:[#allocation5 + $0x250] ss:$8 sps:$4 sm:$0xff]   ;;  %v3017_v10 = vld [vmem:[#allocation5 + $0x244] ss:$8 sps:$4 sm:$0xff]   ;;  %v3015_v11 = vld [vmem:[#allocation5 + $0x240] ss:$8 sps:$4 sm:$0xff]  }
  0x3f   :  { %523 = vmatprep.subr.bf16.mxu1 %v2973_v34  ;;  %v3020_v12 = vld [vmem:[#allocation5 + $0x234] ss:$8 sps:$4 sm:$0xff]   ;;  %v3023_v14 = vld [vmem:[#allocation5 + $0x224] ss:$8 sps:$4 sm:$0xff]   ;;  %v3021_v15 = vld [vmem:[#allocation5 + $0x220] ss:$8 sps:$4 sm:$0xff]  }
  0x40   :  { %275 = vmatpush1.bf16.msra.mxu0 %v2930_v13  ;;  %v3018_v13 = vld [vmem:[#allocation5 + $0x230] ss:$8 sps:$4 sm:$0xff]   ;;  %v3026_v16 = vld [vmem:[#allocation5 + $0x214] ss:$8 sps:$4 sm:$0xff]   ;;  %v3027_v19 = vld [vmem:[#allocation5 + $0x200] ss:$8 sps:$4 sm:$0xff]  }
  0x41   :  { %276 = vmatprep.subr.bf16.mxu0 %v2931_v18  ;;  %v3024_v17 = vld [vmem:[#allocation5 + $0x210] ss:$8 sps:$4 sm:$0xff]   ;;  %v3029_v18 = vld [vmem:[#allocation5 + $0x204] ss:$8 sps:$4 sm:$0xff]   ;;  %v3056_v54 = vld [vmem:[#allocation5 + $0x374] ss:$8 sps:$4 sm:$0xff]  }
  0x42   :  { %524 = vmatpush1.bf16.msra.mxu1 %v2975_v36  ;;  %v3030_v21 = vld [vmem:[#allocation5 + $0x2f0] ss:$8 sps:$4 sm:$0xff]   ;;  %v3035_v22 = vld [vmem:[#allocation5 + $0x2e4] ss:$8 sps:$4 sm:$0xff]   ;;  %s3450_s30 = scalar_lea.vmem %s2573_s2, 256 }
  0x43   :  { %525 = vmatprep.subr.bf16.mxu1 %v2976_v38  ;;  %v3036_v25 = vld [vmem:[#allocation5 + $0x2d0] ss:$8 sps:$4 sm:$0xff]   ;;  %v3041_v26 = vld [vmem:[#allocation5 + $0x2c4] ss:$8 sps:$4 sm:$0xff]   ;;  %p3451_p1 = scmp.ne.s32.totalorder %s2573_s2, %s3450_s30  ;;  %p3456_p3 = scmp.lt.s32.totalorder %s3450_s30, %s3450_s30 }
  0x44   :  { %277 = vmatpush1.bf16.msra.mxu0 %v2933_v20  ;;  %v3032_v20 = vld [vmem:[#allocation5 + $0x2f4] ss:$8 sps:$4 sm:$0xff]   ;;  %v3042_v29 = vld [vmem:[#allocation5 + $0x2b0] ss:$8 sps:$4 sm:$0xff]   ;;  %v3047_v30 = vld [vmem:[#allocation5 + $0x2a4] ss:$8 sps:$4 sm:$0xff]  }
  0x45   :  { %278 = vmatprep.subr.bf16.mxu0 %v2934_v23  ;;  %v3033_v23 = vld [vmem:[#allocation5 + $0x2e0] ss:$8 sps:$4 sm:$0xff]   ;;  %p3457_p4 = por %p3456_p3, %p3455_p2 }
  0x46   :  { %526 = vmatpush1.bf16.msra.mxu1 %v2978_v40 }
  0x47   :  { %527 = vmatprep.subr.bf16.mxu1 %v2979_v42  ;;  %p3458_p5 = pnand %p3457_p4, %p3451_p1 }
  0x48   :  { %279 = vmatpush2.bf16.msra.mxu0 %v2936_v24  ;;  %v3038_v24 = vld [vmem:[#allocation5 + $0x2d4] ss:$8 sps:$4 sm:$0xff]  }
  0x49   :  { %280 = vmatprep.subr.bf16.mxu0 %v2937_v27  ;;  %v3039_v27 = vld [vmem:[#allocation5 + $0x2c0] ss:$8 sps:$4 sm:$0xff]  }
  0x4a   :  { %528 = vmatpush1.bf16.msra.mxu1 %v2981_v44 }
  0x4b   :  { %529 = vmatprep.subr.bf16.mxu1 %v2982_v46 }
  0x4c   :  { %281 = vmatpush2.bf16.msra.mxu0 %v2939_v28  ;;  %v3044_v28 = vld [vmem:[#allocation5 + $0x2b4] ss:$8 sps:$4 sm:$0xff]  }
  0x4d   :  { %282 = vmatprep.subr.bf16.mxu0 %v2940_v31  ;;  %v3045_v31 = vld [vmem:[#allocation5 + $0x2a0] ss:$8 sps:$4 sm:$0xff]  }
  0x4e   :  { %530 = vmatpush2.bf16.msra.mxu1 %v2984_v48 }
  0x4f   :  { %531 = vmatprep.subr.bf16.mxu1 %v2985_v50  ;;  %v3048_v50 = vld [vmem:[#allocation5 + $0x290] ss:$8 sps:$4 sm:$0xff]  }
  0x50   :  { %283 = vmatpush2.bf16.msra.mxu0 %v2942_v32  ;;  %v92_v32 = vlaneseq }
  0x51   :  { %284 = vmatprep.subr.bf16.mxu0 %v2943_v35  ;;  %v90_v35 = vld [vmem:[#allocation7] sm:$0x3] }
  0x52   :  { %532 = vmatpush2.bf16.msra.mxu1 %v2987_v52  ;;  %v93_v33 = vshrl.u32 %v92_v32, 7  ;;  %v3051_v52 = vld [vmem:[#allocation5 + $0x280] ss:$8 sps:$4 sm:$0xff]   ;;  %v3101_v32 = vld [vmem:[#allocation5 + $0x384] ss:$8 sps:$4 sm:$0xff]  }
  0x53   :  { %533 = vmatprep.subr.bf16.mxu1 %v2988_v55  ;;  %v3059_v55 = vld [vmem:[#allocation5 + $0x364] ss:$8 sps:$4 sm:$0xff]  }
  0x54   :  { %285 = vmatpush2.bf16.msra.mxu0 %v2945_v37  ;;  %v3513_v34 = vsub.s32 0, %v93_v33  ;;  %v3515_v36 = vsub.s32 1, %v93_v33  ;;  %v3099_v33 = vld [vmem:[#allocation5 + $0x380] ss:$8 sps:$4 sm:$0xff]  }
  0x55   :  { %286 = vmatprep.subr.bf16.mxu0 %v2946_v39 }
  0x56   :  { %534 = vmatpush2.bf16.msra.mxu1 %v2990_v56  ;;  %v95_v37 = vrot.slane %v90_v35, %v3513_v34  ;;  %v99_v38 = vrot.slane %v90_v35, %v3515_v36  ;;  %v3057_v56 = vld [vmem:[#allocation5 + $0x360] ss:$8 sps:$4 sm:$0xff]   ;;  %v3102_v35 = vld [vmem:[#allocation5 + $0x470] ss:$8 sps:$4 sm:$0xff]  }
  0x57   :  { %535 = vmatprep.subr.bf16.mxu1 %v2991_v57  ;;  %v3062_v57 = vld [vmem:[#allocation5 + $0x354] ss:$8 sps:$4 sm:$0xff]  }
  0x58   :  { %287 = vmatpush2.bf16.msra.mxu0 %v2948_v41 }
  0x59   :  { %288 = vmatprep.subr.bf16.mxu0 %v2949_v43 }
  0x5a   :  { %536 = vmatpush2.bf16.msra.mxu1 %v2993_v59  ;;  %v3065_v59 = vld [vmem:[#allocation5 + $0x344] ss:$8 sps:$4 sm:$0xff]  }
  0x5b   :  { %537 = vmatprep.subr.bf16.mxu1 %v2994_v60  ;;  %v3063_v60 = vld [vmem:[#allocation5 + $0x340] ss:$8 sps:$4 sm:$0xff]  }
  0x5c   :  { %289 = vmatpush2.bf16.msra.mxu0 %v2951_v45 }
  0x5d   :  { %290 = vmatprep.subr.bf16.mxu0 %v2952_v47 }
  0x5e   :  { %538 = vmatpush2.bf16.msra.mxu1 %v2996_v61  ;;  %v3068_v61 = vld [vmem:[#allocation5 + $0x334] ss:$8 sps:$4 sm:$0xff]  }
  0x5f   :  { %539 = vmatprep.subr.bf16.mxu1 %v2997_v62  ;;  %v3066_v62 = vld [vmem:[#allocation5 + $0x330] ss:$8 sps:$4 sm:$0xff]  }
  0x60   :  { %291 = vmatpush2.bf16.msra.mxu0 %v2954_v49  ;;  %v3050_v49 = vld [vmem:[#allocation5 + $0x294] ss:$8 sps:$4 sm:$0xff]  }
  0x61   :  { %292 = vmatprep.subr.bf16.mxu0 %v2955_v51  ;;  %v3053_v51 = vld [vmem:[#allocation5 + $0x284] ss:$8 sps:$4 sm:$0xff]  }
  0x62   :  { %540 = vmatpush2.bf16.msra.mxu1 %v2999_v63  ;;  %v3071_v63 = vld [vmem:[#allocation5 + $0x324] ss:$8 sps:$4 sm:$0xff]  }
  0x63   :  { %541 = vmatprep.subr.bf16.mxu1 %v3000_v0  ;;  %v3069_v0 = vld [vmem:[#allocation5 + $0x320] ss:$8 sps:$4 sm:$0xff]  }
  0x64   :  { %293 = vmatpush2.bf16.msra.mxu0 %v2957_v53  ;;  %v3054_v53 = vld [vmem:[#allocation5 + $0x370] ss:$8 sps:$4 sm:$0xff]  }
  0x65   :  { %764 = vmatprep.subr.bf16.mxu0 %v3008_v5  ;;  %v3080_v5 = vld [vmem:[#allocation5 + $0x3f4] ss:$8 sps:$4 sm:$0xff]  }
  0x66   :  { %542 = vmatpush2.bf16.msra.mxu1 %v3002_v1  ;;  %v3074_v1 = vld [vmem:[#allocation5 + $0x314] ss:$8 sps:$4 sm:$0xff]  }
  0x67   :  { %295 = vmatmul.mubr.bf16.vlgmr.msra.gmra.mxu0 %v56_v58  ;;  %543 = vmatprep.subr.bf16.mxu1 %v3003_v2  ;;  %v3060_v58 = vld [vmem:[#allocation5 + $0x350] ss:$8 sps:$4 sm:$0xff]  }
  0x68   :  { %765 = vmatpush1.bf16.msra.mxu0 %v3006_v4  ;;  %v3072_v2 = vld [vmem:[#allocation5 + $0x310] ss:$8 sps:$4 sm:$0xff]   ;;  %v3075_v4 = vld [vmem:[#allocation5 + $0x300] ss:$8 sps:$4 sm:$0xff]  }
  0x69   :  { %766 = vmatprep.subr.bf16.mxu0 %v3011_v6  ;;  %v3078_v6 = vld [vmem:[#allocation5 + $0x3f0] ss:$8 sps:$4 sm:$0xff]  }
  0x6a   :  { %544 = vmatpush2.bf16.msra.mxu1 %v3005_v3  ;;  %v3077_v3 = vld [vmem:[#allocation5 + $0x304] ss:$8 sps:$4 sm:$0xff]  }
  0x6b   :  { %1015 = vmatprep.subr.bf16.mxu1 %v3056_v54  ;;  %v3131_v54 = vld [vmem:[#allocation5 + $0x4e4] ss:$8 sps:$4 sm:$0xff]  }
  0x6c   :  { %767 = vmatpush1.bf16.msra.mxu0 %v3009_v7  ;;  %v3083_v7 = vld [vmem:[#allocation5 + $0x3e4] ss:$8 sps:$4 sm:$0xff]  }
  0x6d   :  { %768 = vmatprep.subr.bf16.mxu0 %v3014_v8  ;;  %v3081_v8 = vld [vmem:[#allocation5 + $0x3e0] ss:$8 sps:$4 sm:$0xff]  }
  0x70   :  { %769 = vmatpush1.bf16.msra.mxu0 %v3012_v9  ;;  %v3086_v9 = vld [vmem:[#allocation5 + $0x3d4] ss:$8 sps:$4 sm:$0xff]  }
  0x71   :  { %770 = vmatprep.subr.bf16.mxu0 %v3017_v10  ;;  %v3084_v10 = vld [vmem:[#allocation5 + $0x3d0] ss:$8 sps:$4 sm:$0xff]  }
  0x74   :  { %771 = vmatpush1.bf16.msra.mxu0 %v3015_v11  ;;  %v3089_v11 = vld [vmem:[#allocation5 + $0x3c4] ss:$8 sps:$4 sm:$0xff]  }
  0x75   :  { %772 = vmatprep.subr.bf16.mxu0 %v3020_v12  ;;  %v3087_v12 = vld [vmem:[#allocation5 + $0x3c0] ss:$8 sps:$4 sm:$0xff]  }
  0x78   :  { %773 = vmatpush1.bf16.msra.mxu0 %v3018_v13  ;;  %v3092_v13 = vld [vmem:[#allocation5 + $0x3b4] ss:$8 sps:$4 sm:$0xff]  }
  0x79   :  { %774 = vmatprep.subr.bf16.mxu0 %v3023_v14  ;;  %v3090_v14 = vld [vmem:[#allocation5 + $0x3b0] ss:$8 sps:$4 sm:$0xff]  }
  0x7c   :  { %775 = vmatpush1.bf16.msra.mxu0 %v3021_v15  ;;  %v3095_v15 = vld [vmem:[#allocation5 + $0x3a4] ss:$8 sps:$4 sm:$0xff]  }
  0x7d   :  { %776 = vmatprep.subr.bf16.mxu0 %v3026_v16  ;;  %v3093_v16 = vld [vmem:[#allocation5 + $0x3a0] ss:$8 sps:$4 sm:$0xff]  }
  0x80   :  { %777 = vmatpush1.bf16.msra.mxu0 %v3024_v17  ;;  %v341_v17 = vld [vmem:[#allocation7 + $0x2] sm:$0x3] }
  0x81   :  { %778 = vmatprep.subr.bf16.mxu0 %v3029_v18  ;;  %v346_v18 = vrot.slane %v341_v17, %v3513_v34 }
  0x84   :  { %779 = vmatpush1.bf16.msra.mxu0 %v3027_v19  ;;  %v350_v19 = vrot.slane %v341_v17, %v3515_v36  ;;  %v3150_v17 = vld [vmem:[#allocation5 + $0x570] ss:$8 sps:$4 sm:$0xff]  }
  0x85   :  { %780 = vmatprep.subr.bf16.mxu0 %v3032_v20 }
  0x88   :  { %781 = vmatpush2.bf16.msra.mxu0 %v3030_v21 }
  0x89   :  { %782 = vmatprep.subr.bf16.mxu0 %v3035_v22 }
  0x8c   :  { %783 = vmatpush2.bf16.msra.mxu0 %v3033_v23 }
  0x8d   :  { %784 = vmatprep.subr.bf16.mxu0 %v3038_v24 }
  0x90   :  { %785 = vmatpush2.bf16.msra.mxu0 %v3036_v25 }
  0x91   :  { %786 = vmatprep.subr.bf16.mxu0 %v3041_v26 }
  0x94   :  { %787 = vmatpush2.bf16.msra.mxu0 %v3039_v27 }
  0x95   :  { %788 = vmatprep.subr.bf16.mxu0 %v3044_v28 }
  0x98   :  { %789 = vmatpush2.bf16.msra.mxu0 %v3042_v29 }
  0x99   :  { %790 = vmatprep.subr.bf16.mxu0 %v3047_v30  ;;  %v3098_v30 = vld [vmem:[#allocation5 + $0x394] ss:$8 sps:$4 sm:$0xff]  }
  0x9c   :  { %791 = vmatpush2.bf16.msra.mxu0 %v3045_v31  ;;  %v3096_v31 = vld [vmem:[#allocation5 + $0x390] ss:$8 sps:$4 sm:$0xff]  }
  0x9d   :  { %792 = vmatprep.subr.bf16.mxu0 %v3050_v49  ;;  %v3120_v49 = vld [vmem:[#allocation5 + $0x410] ss:$8 sps:$4 sm:$0xff]  }
  0xa0   :  { %793 = vmatpush2.bf16.msra.mxu0 %v3048_v50  ;;  %v3125_v50 = vld [vmem:[#allocation5 + $0x404] ss:$8 sps:$4 sm:$0xff]  }
  0xa1   :  { %794 = vmatprep.subr.bf16.mxu0 %v3053_v51  ;;  %v3123_v51 = vld [vmem:[#allocation5 + $0x400] ss:$8 sps:$4 sm:$0xff]  }
  0xa4   :  { %795 = vmatpush2.bf16.msra.mxu0 %v3051_v52  ;;  %v3128_v52 = vld [vmem:[#allocation5 + $0x4f4] ss:$8 sps:$4 sm:$0xff]  }
 0x127   :  { %v296_v39 = vpop.f32.mrf.mxu0 }
 0x128   :  { %v297_v40 = vadd.f32 %v296_v39, %v95_v37  ;;  %v3104_v37 = vld [vmem:[#allocation5 + $0x474] ss:$8 sps:$4 sm:$0xff]   ;;  %v3105_v39 = vld [vmem:[#allocation5 + $0x460] ss:$8 sps:$4 sm:$0xff]  }
 0x129   :  { %v298_v41 = vpop.f32.mrf.mxu0  ;;  %1266 = vmatprep.subr.bf16.mxu0 %v3104_v37  ;;  %v3179_v37 = vld [vmem:[#allocation5 + $0x5e4] ss:$8 sps:$4 sm:$0xff]  }
 0x12a   :  { %v299_v42 = vadd.f32 %v298_v41, %v99_v38  ;;  %v303_v43 = vmax.f32 %v297_v40, 0.0  ;;  %v3107_v38 = vld [vmem:[#allocation5 + $0x464] ss:$8 sps:$4 sm:$0xff]   ;;  %v3110_v40 = vld [vmem:[#allocation5 + $0x454] ss:$8 sps:$4 sm:$0xff]  }
 0x12b   :  { %v300_v44 = vpop.f32.mrf.mxu0  ;;  %v3108_v41 = vld [vmem:[#allocation5 + $0x450] ss:$8 sps:$4 sm:$0xff]  }
 0x12c   :  { %v304_v45 = vmax.f32 %v299_v42, 0.0  ;;  %v305_v48 = vpack.c.bf16 %v303_v43, %v303_v43  ;;  %v3113_v42 = vld [vmem:[#allocation5 + $0x444] ss:$8 sps:$4 sm:$0xff]   ;;  %v3111_v43 = vld [vmem:[#allocation5 + $0x440] ss:$8 sps:$4 sm:$0xff]  }
 0x12d   :  { %v301_v46 = vpop.f32.mrf.mxu0  ;;  %v3116_v44 = vld [vmem:[#allocation5 + $0x434] ss:$8 sps:$4 sm:$0xff]  }
 0x12e   :  { %v306_v47 = vpack.c.bf16 %v304_v45, %v304_v45  ;;  %v3114_v45 = vld [vmem:[#allocation5 + $0x430] ss:$8 sps:$4 sm:$0xff]   ;;  %v3119_v46 = vld [vmem:[#allocation5 + $0x424] ss:$8 sps:$4 sm:$0xff]  }
 0x130   :  { %545 = vmatprep.mubr.bf16.mxu1 %v306_v47  ;;  %v3117_v47 = vld [vmem:[#allocation5 + $0x420] ss:$8 sps:$4 sm:$0xff]  }
 0x131   :  { %546 = vmatmul.mubr.bf16.vlgmr.msra.gmra.mxu1 %v305_v48  ;;  %v3122_v48 = vld [vmem:[#allocation5 + $0x414] ss:$8 sps:$4 sm:$0xff]  }
 0x132   :  { %1016 = vmatpush1.bf16.msra.mxu1 %v3054_v53  ;;  %v3126_v53 = vld [vmem:[#allocation5 + $0x4f0] ss:$8 sps:$4 sm:$0xff]  }
 0x133   :  { %1017 = vmatprep.subr.bf16.mxu1 %v3059_v55  ;;  %v3129_v55 = vld [vmem:[#allocation5 + $0x4e0] ss:$8 sps:$4 sm:$0xff]  }
 0x136   :  { %1018 = vmatpush1.bf16.msra.mxu1 %v3057_v56  ;;  %v3134_v56 = vld [vmem:[#allocation5 + $0x4d4] ss:$8 sps:$4 sm:$0xff]  }
 0x137   :  { %1019 = vmatprep.subr.bf16.mxu1 %v3062_v57  ;;  %v3132_v57 = vld [vmem:[#allocation5 + $0x4d0] ss:$8 sps:$4 sm:$0xff]  }
 0x13a   :  { %1020 = vmatpush1.bf16.msra.mxu1 %v3060_v58  ;;  %v3137_v58 = vld [vmem:[#allocation5 + $0x4c4] ss:$8 sps:$4 sm:$0xff]  }
 0x13b   :  { %1021 = vmatprep.subr.bf16.mxu1 %v3065_v59  ;;  %v3135_v59 = vld [vmem:[#allocation5 + $0x4c0] ss:$8 sps:$4 sm:$0xff]  }
 0x13e   :  { %1022 = vmatpush1.bf16.msra.mxu1 %v3063_v60  ;;  %v3140_v60 = vld [vmem:[#allocation5 + $0x4b4] ss:$8 sps:$4 sm:$0xff]  }
 0x13f   :  { %1023 = vmatprep.subr.bf16.mxu1 %v3068_v61  ;;  %v3138_v61 = vld [vmem:[#allocation5 + $0x4b0] ss:$8 sps:$4 sm:$0xff]  }
 0x142   :  { %1024 = vmatpush1.bf16.msra.mxu1 %v3066_v62  ;;  %v3143_v62 = vld [vmem:[#allocation5 + $0x4a4] ss:$8 sps:$4 sm:$0xff]  }
 0x143   :  { %1025 = vmatprep.subr.bf16.mxu1 %v3071_v63  ;;  %v3141_v63 = vld [vmem:[#allocation5 + $0x4a0] ss:$8 sps:$4 sm:$0xff]  }
 0x146   :  { %1026 = vmatpush1.bf16.msra.mxu1 %v3069_v0  ;;  %v592_v0 = vld [vmem:[#allocation7 + $0x4] sm:$0x3] }
 0x147   :  { %1027 = vmatprep.subr.bf16.mxu1 %v3074_v1  ;;  %v597_v1 = vrot.slane %v592_v0, %v3513_v34 }
 0x14a   :  { %1028 = vmatpush1.bf16.msra.mxu1 %v3072_v2  ;;  %v601_v2 = vrot.slane %v592_v0, %v3515_v36  ;;  %v3198_v0 = vld [vmem:[#allocation5 + $0x670] ss:$8 sps:$4 sm:$0xff]  }
 0x14b   :  { %1029 = vmatprep.subr.bf16.mxu1 %v3077_v3 }
 0x14e   :  { %1030 = vmatpush1.bf16.msra.mxu1 %v3075_v4 }
 0x14f   :  { %1031 = vmatprep.subr.bf16.mxu1 %v3080_v5 }
 0x152   :  { %1032 = vmatpush2.bf16.msra.mxu1 %v3078_v6 }
 0x153   :  { %1033 = vmatprep.subr.bf16.mxu1 %v3083_v7 }
 0x156   :  { %1034 = vmatpush2.bf16.msra.mxu1 %v3081_v8 }
 0x157   :  { %1035 = vmatprep.subr.bf16.mxu1 %v3086_v9 }
 0x15a   :  { %1036 = vmatpush2.bf16.msra.mxu1 %v3084_v10 }
 0x15b   :  { %1037 = vmatprep.subr.bf16.mxu1 %v3089_v11 }
 0x15e   :  { %1038 = vmatpush2.bf16.msra.mxu1 %v3087_v12 }
 0x15f   :  { %1039 = vmatprep.subr.bf16.mxu1 %v3092_v13  ;;  %v3146_v13 = vld [vmem:[#allocation5 + $0x494] ss:$8 sps:$4 sm:$0xff]  }
 0x162   :  { %1040 = vmatpush2.bf16.msra.mxu1 %v3090_v14  ;;  %v3144_v14 = vld [vmem:[#allocation5 + $0x490] ss:$8 sps:$4 sm:$0xff]  }
 0x163   :  { %1041 = vmatprep.subr.bf16.mxu1 %v3095_v15  ;;  %v3149_v15 = vld [vmem:[#allocation5 + $0x484] ss:$8 sps:$4 sm:$0xff]  }
 0x166   :  { %1042 = vmatpush2.bf16.msra.mxu1 %v3093_v16  ;;  %v3147_v16 = vld [vmem:[#allocation5 + $0x480] ss:$8 sps:$4 sm:$0xff]  }
 0x167   :  { %1043 = vmatprep.subr.bf16.mxu1 %v3098_v30  ;;  %v3168_v30 = vld [vmem:[#allocation5 + $0x510] ss:$8 sps:$4 sm:$0xff]  }
 0x16a   :  { %1044 = vmatpush2.bf16.msra.mxu1 %v3096_v31  ;;  %v3173_v31 = vld [vmem:[#allocation5 + $0x504] ss:$8 sps:$4 sm:$0xff]  }
 0x16b   :  { %1045 = vmatprep.subr.bf16.mxu1 %v3101_v32  ;;  %v3171_v32 = vld [vmem:[#allocation5 + $0x500] ss:$8 sps:$4 sm:$0xff]  }
 0x16e   :  { %1046 = vmatpush2.bf16.msra.mxu1 %v3099_v33  ;;  %v3176_v33 = vld [vmem:[#allocation5 + $0x5f4] ss:$8 sps:$4 sm:$0xff]  }
 0x1f1   :  { %v547_v20 = vpop.f32.mrf.mxu1 }
 0x1f2   :  { %v548_v21 = vadd.f32 %v547_v20, %v346_v18  ;;  %v3152_v18 = vld [vmem:[#allocation5 + $0x574] ss:$8 sps:$4 sm:$0xff]   ;;  %v3153_v20 = vld [vmem:[#allocation5 + $0x560] ss:$8 sps:$4 sm:$0xff]  }
 0x1f3   :  { %v549_v22 = vpop.f32.mrf.mxu1  ;;  %1517 = vmatprep.subr.bf16.mxu1 %v3152_v18  ;;  %v3227_v18 = vld [vmem:[#allocation5 + $0x6e4] ss:$8 sps:$4 sm:$0xff]  }
 0x1f4   :  { %v550_v23 = vadd.f32 %v549_v22, %v350_v19  ;;  %v554_v24 = vmax.f32 %v548_v21, 0.0  ;;  %v3155_v19 = vld [vmem:[#allocation5 + $0x564] ss:$8 sps:$4 sm:$0xff]   ;;  %v3158_v21 = vld [vmem:[#allocation5 + $0x554] ss:$8 sps:$4 sm:$0xff]  }
 0x1f5   :  { %v551_v25 = vpop.f32.mrf.mxu1  ;;  %v3156_v22 = vld [vmem:[#allocation5 + $0x550] ss:$8 sps:$4 sm:$0xff]  }
 0x1f6   :  { %v555_v26 = vmax.f32 %v550_v23, 0.0  ;;  %v556_v29 = vpack.c.bf16 %v554_v24, %v554_v24  ;;  %v3161_v23 = vld [vmem:[#allocation5 + $0x544] ss:$8 sps:$4 sm:$0xff]   ;;  %v3159_v24 = vld [vmem:[#allocation5 + $0x540] ss:$8 sps:$4 sm:$0xff]  }
 0x1f7   :  { %v552_v27 = vpop.f32.mrf.mxu1  ;;  %v3164_v25 = vld [vmem:[#allocation5 + $0x534] ss:$8 sps:$4 sm:$0xff]  }
 0x1f8   :  { %v557_v28 = vpack.c.bf16 %v555_v26, %v555_v26  ;;  %v3162_v26 = vld [vmem:[#allocation5 + $0x530] ss:$8 sps:$4 sm:$0xff]   ;;  %v3167_v27 = vld [vmem:[#allocation5 + $0x524] ss:$8 sps:$4 sm:$0xff]  }
 0x1fa   :  { %796 = vmatprep.mubr.bf16.mxu0 %v557_v28  ;;  %v3165_v28 = vld [vmem:[#allocation5 + $0x520] ss:$8 sps:$4 sm:$0xff]  }
 0x1fb   :  { %797 = vmatmul.mubr.bf16.vlgmr.msra.gmra.mxu0 %v556_v29  ;;  %v3170_v29 = vld [vmem:[#allocation5 + $0x514] ss:$8 sps:$4 sm:$0xff]  }
 0x1fc   :  { %1267 = vmatpush1.bf16.msra.mxu0 %v3102_v35  ;;  %v3174_v35 = vld [vmem:[#allocation5 + $0x5f0] ss:$8 sps:$4 sm:$0xff]  }
 0x1fd   :  { %1268 = vmatprep.subr.bf16.mxu0 %v3107_v38  ;;  %v3177_v38 = vld [vmem:[#allocation5 + $0x5e0] ss:$8 sps:$4 sm:$0xff]  }
 0x200   :  { %1269 = vmatpush1.bf16.msra.mxu0 %v3105_v39  ;;  %v3182_v39 = vld [vmem:[#allocation5 + $0x5d4] ss:$8 sps:$4 sm:$0xff]  }
 0x201   :  { %1270 = vmatprep.subr.bf16.mxu0 %v3110_v40  ;;  %v3180_v40 = vld [vmem:[#allocation5 + $0x5d0] ss:$8 sps:$4 sm:$0xff]  }
 0x204   :  { %1271 = vmatpush1.bf16.msra.mxu0 %v3108_v41  ;;  %v3185_v41 = vld [vmem:[#allocation5 + $0x5c4] ss:$8 sps:$4 sm:$0xff]  }
 0x205   :  { %1272 = vmatprep.subr.bf16.mxu0 %v3113_v42  ;;  %v3183_v42 = vld [vmem:[#allocation5 + $0x5c0] ss:$8 sps:$4 sm:$0xff]  }
 0x208   :  { %1273 = vmatpush1.bf16.msra.mxu0 %v3111_v43  ;;  %v3188_v43 = vld [vmem:[#allocation5 + $0x5b4] ss:$8 sps:$4 sm:$0xff]  }
 0x209   :  { %1274 = vmatprep.subr.bf16.mxu0 %v3116_v44  ;;  %v3186_v44 = vld [vmem:[#allocation5 + $0x5b0] ss:$8 sps:$4 sm:$0xff]  }
 0x20c   :  { %1275 = vmatpush1.bf16.msra.mxu0 %v3114_v45  ;;  %v3191_v45 = vld [vmem:[#allocation5 + $0x5a4] ss:$8 sps:$4 sm:$0xff]  }
 0x20d   :  { %1276 = vmatprep.subr.bf16.mxu0 %v3119_v46  ;;  %v3189_v46 = vld [vmem:[#allocation5 + $0x5a0] ss:$8 sps:$4 sm:$0xff]  }
 0x210   :  { %1277 = vmatpush1.bf16.msra.mxu0 %v3117_v47  ;;  %v843_v47 = vld [vmem:[#allocation7 + $0x6] sm:$0x3] }
 0x211   :  { %1278 = vmatprep.subr.bf16.mxu0 %v3122_v48  ;;  %v848_v48 = vrot.slane %v843_v47, %v3513_v34 }
 0x214   :  { %1279 = vmatpush1.bf16.msra.mxu0 %v3120_v49  ;;  %v852_v49 = vrot.slane %v843_v47, %v3515_v36  ;;  %v3246_v47 = vld [vmem:[#allocation5 + $0x770] ss:$8 sps:$4 sm:$0xff]  }
 0x215   :  { %1280 = vmatprep.subr.bf16.mxu0 %v3125_v50 }
 0x218   :  { %1281 = vmatpush1.bf16.msra.mxu0 %v3123_v51 }
 0x219   :  { %1282 = vmatprep.subr.bf16.mxu0 %v3128_v52 }
 0x21c   :  { %1283 = vmatpush2.bf16.msra.mxu0 %v3126_v53 }
 0x21d   :  { %1284 = vmatprep.subr.bf16.mxu0 %v3131_v54 }
 0x220   :  { %1285 = vmatpush2.bf16.msra.mxu0 %v3129_v55 }
 0x221   :  { %1286 = vmatprep.subr.bf16.mxu0 %v3134_v56 }
 0x224   :  { %1287 = vmatpush2.bf16.msra.mxu0 %v3132_v57 }
 0x225   :  { %1288 = vmatprep.subr.bf16.mxu0 %v3137_v58 }
 0x228   :  { %1289 = vmatpush2.bf16.msra.mxu0 %v3135_v59 }
 0x229   :  { %1290 = vmatprep.subr.bf16.mxu0 %v3140_v60  ;;  %v3194_v60 = vld [vmem:[#allocation5 + $0x594] ss:$8 sps:$4 sm:$0xff]  }
 0x22c   :  { %1291 = vmatpush2.bf16.msra.mxu0 %v3138_v61  ;;  %v3192_v61 = vld [vmem:[#allocation5 + $0x590] ss:$8 sps:$4 sm:$0xff]  }
 0x22d   :  { %1292 = vmatprep.subr.bf16.mxu0 %v3143_v62  ;;  %v3197_v62 = vld [vmem:[#allocation5 + $0x584] ss:$8 sps:$4 sm:$0xff]  }
 0x230   :  { %1293 = vmatpush2.bf16.msra.mxu0 %v3141_v63  ;;  %v3195_v63 = vld [vmem:[#allocation5 + $0x580] ss:$8 sps:$4 sm:$0xff]  }
 0x231   :  { %1294 = vmatprep.subr.bf16.mxu0 %v3146_v13  ;;  %v3216_v13 = vld [vmem:[#allocation5 + $0x610] ss:$8 sps:$4 sm:$0xff]  }
 0x234   :  { %1295 = vmatpush2.bf16.msra.mxu0 %v3144_v14  ;;  %v3221_v14 = vld [vmem:[#allocation5 + $0x604] ss:$8 sps:$4 sm:$0xff]  }
 0x235   :  { %1296 = vmatprep.subr.bf16.mxu0 %v3149_v15  ;;  %v3219_v15 = vld [vmem:[#allocation5 + $0x600] ss:$8 sps:$4 sm:$0xff]  }
 0x238   :  { %1297 = vmatpush2.bf16.msra.mxu0 %v3147_v16  ;;  %v3224_v16 = vld [vmem:[#allocation5 + $0x6f4] ss:$8 sps:$4 sm:$0xff]  }
 0x2bb   :  { %v798_v3 = vpop.f32.mrf.mxu0 }
 0x2bc   :  { %v799_v4 = vadd.f32 %v798_v3, %v597_v1  ;;  %v3200_v1 = vld [vmem:[#allocation5 + $0x674] ss:$8 sps:$4 sm:$0xff]   ;;  %v3201_v3 = vld [vmem:[#allocation5 + $0x660] ss:$8 sps:$4 sm:$0xff]  }
 0x2bd   :  { %v800_v5 = vpop.f32.mrf.mxu0  ;;  %1768 = vmatprep.subr.bf16.mxu0 %v3200_v1  ;;  %v3275_v1 = vld [vmem:[#allocation5 + $0x7e4] ss:$8 sps:$4 sm:$0xff]  }
 0x2be   :  { %v801_v6 = vadd.f32 %v800_v5, %v601_v2  ;;  %v805_v7 = vmax.f32 %v799_v4, 0.0  ;;  %v3203_v2 = vld [vmem:[#allocation5 + $0x664] ss:$8 sps:$4 sm:$0xff]   ;;  %v3206_v4 = vld [vmem:[#allocation5 + $0x654] ss:$8 sps:$4 sm:$0xff]  }
 0x2bf   :  { %v802_v8 = vpop.f32.mrf.mxu0  ;;  %v3204_v5 = vld [vmem:[#allocation5 + $0x650] ss:$8 sps:$4 sm:$0xff]  }
 0x2c0   :  { %v806_v9 = vmax.f32 %v801_v6, 0.0  ;;  %v807_v12 = vpack.c.bf16 %v805_v7, %v805_v7  ;;  %v3209_v6 = vld [vmem:[#allocation5 + $0x644] ss:$8 sps:$4 sm:$0xff]   ;;  %v3207_v7 = vld [vmem:[#allocation5 + $0x640] ss:$8 sps:$4 sm:$0xff]  }
 0x2c1   :  { %v803_v10 = vpop.f32.mrf.mxu0  ;;  %v3212_v8 = vld [vmem:[#allocation5 + $0x634] ss:$8 sps:$4 sm:$0xff]  }
 0x2c2   :  { %v808_v11 = vpack.c.bf16 %v806_v9, %v806_v9  ;;  %v3210_v9 = vld [vmem:[#allocation5 + $0x630] ss:$8 sps:$4 sm:$0xff]   ;;  %v3215_v10 = vld [vmem:[#allocation5 + $0x624] ss:$8 sps:$4 sm:$0xff]  }
 0x2c4   :  { %1047 = vmatprep.mubr.bf16.mxu1 %v808_v11  ;;  %v3213_v11 = vld [vmem:[#allocation5 + $0x620] ss:$8 sps:$4 sm:$0xff]  }
 0x2c5   :  { %1048 = vmatmul.mubr.bf16.vlgmr.msra.gmra.mxu1 %v807_v12  ;;  %v3218_v12 = vld [vmem:[#allocation5 + $0x614] ss:$8 sps:$4 sm:$0xff]  }
 0x2c6   :  { %1518 = vmatpush1.bf16.msra.mxu1 %v3150_v17  ;;  %v3222_v17 = vld [vmem:[#allocation5 + $0x6f0] ss:$8 sps:$4 sm:$0xff]  }
 0x2c7   :  { %1519 = vmatprep.subr.bf16.mxu1 %v3155_v19  ;;  %v3225_v19 = vld [vmem:[#allocation5 + $0x6e0] ss:$8 sps:$4 sm:$0xff]  }
 0x2ca   :  { %1520 = vmatpush1.bf16.msra.mxu1 %v3153_v20  ;;  %v3230_v20 = vld [vmem:[#allocation5 + $0x6d4] ss:$8 sps:$4 sm:$0xff]  }
 0x2cb   :  { %1521 = vmatprep.subr.bf16.mxu1 %v3158_v21  ;;  %v3228_v21 = vld [vmem:[#allocation5 + $0x6d0] ss:$8 sps:$4 sm:$0xff]  }
 0x2ce   :  { %1522 = vmatpush1.bf16.msra.mxu1 %v3156_v22  ;;  %v3233_v22 = vld [vmem:[#allocation5 + $0x6c4] ss:$8 sps:$4 sm:$0xff]  }
 0x2cf   :  { %1523 = vmatprep.subr.bf16.mxu1 %v3161_v23  ;;  %v3231_v23 = vld [vmem:[#allocation5 + $0x6c0] ss:$8 sps:$4 sm:$0xff]  }
 0x2d2   :  { %1524 = vmatpush1.bf16.msra.mxu1 %v3159_v24  ;;  %v3236_v24 = vld [vmem:[#allocation5 + $0x6b4] ss:$8 sps:$4 sm:$0xff]  }
 0x2d3   :  { %1525 = vmatprep.subr.bf16.mxu1 %v3164_v25  ;;  %v3234_v25 = vld [vmem:[#allocation5 + $0x6b0] ss:$8 sps:$4 sm:$0xff]  }
 0x2d6   :  { %1526 = vmatpush1.bf16.msra.mxu1 %v3162_v26  ;;  %v3239_v26 = vld [vmem:[#allocation5 + $0x6a4] ss:$8 sps:$4 sm:$0xff]  }
 0x2d7   :  { %1527 = vmatprep.subr.bf16.mxu1 %v3167_v27  ;;  %v3237_v27 = vld [vmem:[#allocation5 + $0x6a0] ss:$8 sps:$4 sm:$0xff]  }
 0x2da   :  { %1528 = vmatpush1.bf16.msra.mxu1 %v3165_v28  ;;  %v1094_v28 = vld [vmem:[#allocation7 + $0x8] sm:$0x3] }
 0x2db   :  { %1529 = vmatprep.subr.bf16.mxu1 %v3170_v29  ;;  %v1099_v29 = vrot.slane %v1094_v28, %v3513_v34 }
 0x2de   :  { %1530 = vmatpush1.bf16.msra.mxu1 %v3168_v30  ;;  %v1103_v30 = vrot.slane %v1094_v28, %v3515_v36  ;;  %v3294_v28 = vld [vmem:[#allocation5 + $0x870] ss:$8 sps:$4 sm:$0xff]  }
 0x2df   :  { %1531 = vmatprep.subr.bf16.mxu1 %v3173_v31 }
 0x2e2   :  { %1532 = vmatpush1.bf16.msra.mxu1 %v3171_v32 }
 0x2e3   :  { %1533 = vmatprep.subr.bf16.mxu1 %v3176_v33 }
 0x2e6   :  { %1534 = vmatpush2.bf16.msra.mxu1 %v3174_v35 }
 0x2e7   :  { %1535 = vmatprep.subr.bf16.mxu1 %v3179_v37 }
 0x2ea   :  { %1536 = vmatpush2.bf16.msra.mxu1 %v3177_v38 }
 0x2eb   :  { %1537 = vmatprep.subr.bf16.mxu1 %v3182_v39 }
 0x2ee   :  { %1538 = vmatpush2.bf16.msra.mxu1 %v3180_v40 }
 0x2ef   :  { %1539 = vmatprep.subr.bf16.mxu1 %v3185_v41 }
 0x2f2   :  { %1540 = vmatpush2.bf16.msra.mxu1 %v3183_v42 }
 0x2f3   :  { %1541 = vmatprep.subr.bf16.mxu1 %v3188_v43  ;;  %v3242_v43 = vld [vmem:[#allocation5 + $0x694] ss:$8 sps:$4 sm:$0xff]  }
 0x2f6   :  { %1542 = vmatpush2.bf16.msra.mxu1 %v3186_v44  ;;  %v3240_v44 = vld [vmem:[#allocation5 + $0x690] ss:$8 sps:$4 sm:$0xff]  }
 0x2f7   :  { %1543 = vmatprep.subr.bf16.mxu1 %v3191_v45  ;;  %v3245_v45 = vld [vmem:[#allocation5 + $0x684] ss:$8 sps:$4 sm:$0xff]  }
 0x2fa   :  { %1544 = vmatpush2.bf16.msra.mxu1 %v3189_v46  ;;  %v3243_v46 = vld [vmem:[#allocation5 + $0x680] ss:$8 sps:$4 sm:$0xff]  }
 0x2fb   :  { %1545 = vmatprep.subr.bf16.mxu1 %v3194_v60  ;;  %v3264_v60 = vld [vmem:[#allocation5 + $0x710] ss:$8 sps:$4 sm:$0xff]  }
 0x2fe   :  { %1546 = vmatpush2.bf16.msra.mxu1 %v3192_v61  ;;  %v3269_v61 = vld [vmem:[#allocation5 + $0x704] ss:$8 sps:$4 sm:$0xff]  }
 0x2ff   :  { %1547 = vmatprep.subr.bf16.mxu1 %v3197_v62  ;;  %v3267_v62 = vld [vmem:[#allocation5 + $0x700] ss:$8 sps:$4 sm:$0xff]  }
 0x302   :  { %1548 = vmatpush2.bf16.msra.mxu1 %v3195_v63  ;;  %v3272_v63 = vld [vmem:[#allocation5 + $0x7f4] ss:$8 sps:$4 sm:$0xff]  }
 0x385   :  { %v1049_v50 = vpop.f32.mrf.mxu1 }
 0x386   :  { %v1050_v51 = vadd.f32 %v1049_v50, %v848_v48  ;;  %v3248_v48 = vld [vmem:[#allocation5 + $0x774] ss:$8 sps:$4 sm:$0xff]   ;;  %v3249_v50 = vld [vmem:[#allocation5 + $0x760] ss:$8 sps:$4 sm:$0xff]  }
 0x387   :  { %v1051_v52 = vpop.f32.mrf.mxu1  ;;  %2019 = vmatprep.subr.bf16.mxu1 %v3248_v48  ;;  %v3323_v48 = vld [vmem:[#allocation5 + $0x8e4] ss:$8 sps:$4 sm:$0xff]  }
 0x388   :  { %v1052_v53 = vadd.f32 %v1051_v52, %v852_v49  ;;  %v1056_v54 = vmax.f32 %v1050_v51, 0.0  ;;  %v3251_v49 = vld [vmem:[#allocation5 + $0x764] ss:$8 sps:$4 sm:$0xff]   ;;  %v3254_v51 = vld [vmem:[#allocation5 + $0x754] ss:$8 sps:$4 sm:$0xff]  }
 0x389   :  { %v1053_v55 = vpop.f32.mrf.mxu1  ;;  %v3252_v52 = vld [vmem:[#allocation5 + $0x750] ss:$8 sps:$4 sm:$0xff]  }
 0x38a   :  { %v1057_v56 = vmax.f32 %v1052_v53, 0.0  ;;  %v1058_v59 = vpack.c.bf16 %v1056_v54, %v1056_v54  ;;  %v3257_v53 = vld [vmem:[#allocation5 + $0x744] ss:$8 sps:$4 sm:$0xff]   ;;  %v3255_v54 = vld [vmem:[#allocation5 + $0x740] ss:$8 sps:$4 sm:$0xff]  }
 0x38b   :  { %v1054_v57 = vpop.f32.mrf.mxu1  ;;  %v3260_v55 = vld [vmem:[#allocation5 + $0x734] ss:$8 sps:$4 sm:$0xff]  }
 0x38c   :  { %v1059_v58 = vpack.c.bf16 %v1057_v56, %v1057_v56  ;;  %v3258_v56 = vld [vmem:[#allocation5 + $0x730] ss:$8 sps:$4 sm:$0xff]   ;;  %v3263_v57 = vld [vmem:[#allocation5 + $0x724] ss:$8 sps:$4 sm:$0xff]  }
 0x38e   :  { %1298 = vmatprep.mubr.bf16.mxu0 %v1059_v58  ;;  %v3261_v58 = vld [vmem:[#allocation5 + $0x720] ss:$8 sps:$4 sm:$0xff]  }
 0x38f   :  { %1299 = vmatmul.mubr.bf16.vlgmr.msra.gmra.mxu0 %v1058_v59  ;;  %v3266_v59 = vld [vmem:[#allocation5 + $0x714] ss:$8 sps:$4 sm:$0xff]  }
 0x390   :  { %1769 = vmatpush1.bf16.msra.mxu0 %v3198_v0  ;;  %v3270_v0 = vld [vmem:[#allocation5 + $0x7f0] ss:$8 sps:$4 sm:$0xff]  }
 0x391   :  { %1770 = vmatprep.subr.bf16.mxu0 %v3203_v2  ;;  %v3273_v2 = vld [vmem:[#allocation5 + $0x7e0] ss:$8 sps:$4 sm:$0xff]  }
 0x394   :  { %1771 = vmatpush1.bf16.msra.mxu0 %v3201_v3  ;;  %v3278_v3 = vld [vmem:[#allocation5 + $0x7d4] ss:$8 sps:$4 sm:$0xff]  }
 0x395   :  { %1772 = vmatprep.subr.bf16.mxu0 %v3206_v4  ;;  %v3276_v4 = vld [vmem:[#allocation5 + $0x7d0] ss:$8 sps:$4 sm:$0xff]  }
 0x398   :  { %1773 = vmatpush1.bf16.msra.mxu0 %v3204_v5  ;;  %v3281_v5 = vld [vmem:[#allocation5 + $0x7c4] ss:$8 sps:$4 sm:$0xff]  }
 0x399   :  { %1774 = vmatprep.subr.bf16.mxu0 %v3209_v6  ;;  %v3279_v6 = vld [vmem:[#allocation5 + $0x7c0] ss:$8 sps:$4 sm:$0xff]  }
 0x39c   :  { %1775 = vmatpush1.bf16.msra.mxu0 %v3207_v7  ;;  %v3284_v7 = vld [vmem:[#allocation5 + $0x7b4] ss:$8 sps:$4 sm:$0xff]  }
 0x39d   :  { %1776 = vmatprep.subr.bf16.mxu0 %v3212_v8  ;;  %v3282_v8 = vld [vmem:[#allocation5 + $0x7b0] ss:$8 sps:$4 sm:$0xff]  }
 0x3a0   :  { %1777 = vmatpush1.bf16.msra.mxu0 %v3210_v9  ;;  %v3287_v9 = vld [vmem:[#allocation5 + $0x7a4] ss:$8 sps:$4 sm:$0xff]  }
 0x3a1   :  { %1778 = vmatprep.subr.bf16.mxu0 %v3215_v10  ;;  %v3285_v10 = vld [vmem:[#allocation5 + $0x7a0] ss:$8 sps:$4 sm:$0xff]  }
 0x3a4   :  { %1779 = vmatpush1.bf16.msra.mxu0 %v3213_v11  ;;  %v1345_v11 = vld [vmem:[#allocation7 + $0xa] sm:$0x3] }
 0x3a5   :  { %1780 = vmatprep.subr.bf16.mxu0 %v3218_v12  ;;  %v1350_v12 = vrot.slane %v1345_v11, %v3513_v34 }
 0x3a8   :  { %1781 = vmatpush1.bf16.msra.mxu0 %v3216_v13  ;;  %v1354_v13 = vrot.slane %v1345_v11, %v3515_v36  ;;  %v3342_v11 = vld [vmem:[#allocation5 + $0x970] ss:$8 sps:$4 sm:$0xff]  }
 0x3a9   :  { %1782 = vmatprep.subr.bf16.mxu0 %v3221_v14 }
 0x3ac   :  { %1783 = vmatpush1.bf16.msra.mxu0 %v3219_v15 }
 0x3ad   :  { %1784 = vmatprep.subr.bf16.mxu0 %v3224_v16 }
 0x3b0   :  { %1785 = vmatpush2.bf16.msra.mxu0 %v3222_v17 }
 0x3b1   :  { %1786 = vmatprep.subr.bf16.mxu0 %v3227_v18 }
 0x3b4   :  { %1787 = vmatpush2.bf16.msra.mxu0 %v3225_v19 }
 0x3b5   :  { %1788 = vmatprep.subr.bf16.mxu0 %v3230_v20 }
 0x3b8   :  { %1789 = vmatpush2.bf16.msra.mxu0 %v3228_v21 }
 0x3b9   :  { %1790 = vmatprep.subr.bf16.mxu0 %v3233_v22 }
 0x3bc   :  { %1791 = vmatpush2.bf16.msra.mxu0 %v3231_v23 }
 0x3bd   :  { %1792 = vmatprep.subr.bf16.mxu0 %v3236_v24  ;;  %v3290_v24 = vld [vmem:[#allocation5 + $0x794] ss:$8 sps:$4 sm:$0xff]  }
 0x3c0   :  { %1793 = vmatpush2.bf16.msra.mxu0 %v3234_v25  ;;  %v3288_v25 = vld [vmem:[#allocation5 + $0x790] ss:$8 sps:$4 sm:$0xff]  }
 0x3c1   :  { %1794 = vmatprep.subr.bf16.mxu0 %v3239_v26  ;;  %v3293_v26 = vld [vmem:[#allocation5 + $0x784] ss:$8 sps:$4 sm:$0xff]  }
 0x3c4   :  { %1795 = vmatpush2.bf16.msra.mxu0 %v3237_v27  ;;  %v3291_v27 = vld [vmem:[#allocation5 + $0x780] ss:$8 sps:$4 sm:$0xff]  }
 0x3c5   :  { %1796 = vmatprep.subr.bf16.mxu0 %v3242_v43  ;;  %v3312_v43 = vld [vmem:[#allocation5 + $0x810] ss:$8 sps:$4 sm:$0xff]  }
 0x3c8   :  { %1797 = vmatpush2.bf16.msra.mxu0 %v3240_v44  ;;  %v3317_v44 = vld [vmem:[#allocation5 + $0x804] ss:$8 sps:$4 sm:$0xff]  }
 0x3c9   :  { %1798 = vmatprep.subr.bf16.mxu0 %v3245_v45  ;;  %v3315_v45 = vld [vmem:[#allocation5 + $0x800] ss:$8 sps:$4 sm:$0xff]  }
 0x3cc   :  { %1799 = vmatpush2.bf16.msra.mxu0 %v3243_v46  ;;  %v3320_v46 = vld [vmem:[#allocation5 + $0x8f4] ss:$8 sps:$4 sm:$0xff]  }
 0x44f   :  { %v1300_v31 = vpop.f32.mrf.mxu0 }
 0x450   :  { %v1301_v32 = vadd.f32 %v1300_v31, %v1099_v29  ;;  %v3296_v29 = vld [vmem:[#allocation5 + $0x874] ss:$8 sps:$4 sm:$0xff]   ;;  %v3297_v31 = vld [vmem:[#allocation5 + $0x860] ss:$8 sps:$4 sm:$0xff]  }
 0x451   :  { %v1302_v33 = vpop.f32.mrf.mxu0  ;;  %2270 = vmatprep.subr.bf16.mxu0 %v3296_v29  ;;  %v3371_v29 = vld [vmem:[#allocation5 + $0x9e4] ss:$8 sps:$4 sm:$0xff]  }
 0x452   :  { %v1303_v35 = vadd.f32 %v1302_v33, %v1103_v30  ;;  %v1307_v37 = vmax.f32 %v1301_v32, 0.0  ;;  %v3299_v30 = vld [vmem:[#allocation5 + $0x864] ss:$8 sps:$4 sm:$0xff]   ;;  %v3302_v32 = vld [vmem:[#allocation5 + $0x854] ss:$8 sps:$4 sm:$0xff]  }
 0x453   :  { %v1304_v38 = vpop.f32.mrf.mxu0  ;;  %v3300_v33 = vld [vmem:[#allocation5 + $0x850] ss:$8 sps:$4 sm:$0xff]  }
 0x454   :  { %v1308_v39 = vmax.f32 %v1303_v35, 0.0  ;;  %v1309_v42 = vpack.c.bf16 %v1307_v37, %v1307_v37  ;;  %v3305_v35 = vld [vmem:[#allocation5 + $0x844] ss:$8 sps:$4 sm:$0xff]   ;;  %v3303_v37 = vld [vmem:[#allocation5 + $0x840] ss:$8 sps:$4 sm:$0xff]  }
 0x455   :  { %v1305_v40 = vpop.f32.mrf.mxu0  ;;  %v3308_v38 = vld [vmem:[#allocation5 + $0x834] ss:$8 sps:$4 sm:$0xff]  }
 0x456   :  { %v1310_v41 = vpack.c.bf16 %v1308_v39, %v1308_v39  ;;  %v3306_v39 = vld [vmem:[#allocation5 + $0x830] ss:$8 sps:$4 sm:$0xff]   ;;  %v3311_v40 = vld [vmem:[#allocation5 + $0x824] ss:$8 sps:$4 sm:$0xff]  }
 0x458   :  { %1549 = vmatprep.mubr.bf16.mxu1 %v1310_v41  ;;  %v3309_v41 = vld [vmem:[#allocation5 + $0x820] ss:$8 sps:$4 sm:$0xff]  }
 0x459   :  { %1550 = vmatmul.mubr.bf16.vlgmr.msra.gmra.mxu1 %v1309_v42  ;;  %v3314_v42 = vld [vmem:[#allocation5 + $0x814] ss:$8 sps:$4 sm:$0xff]  }
 0x45a   :  { %2020 = vmatpush1.bf16.msra.mxu1 %v3246_v47  ;;  %v3318_v47 = vld [vmem:[#allocation5 + $0x8f0] ss:$8 sps:$4 sm:$0xff]  }
 0x45b   :  { %2021 = vmatprep.subr.bf16.mxu1 %v3251_v49  ;;  %v3321_v49 = vld [vmem:[#allocation5 + $0x8e0] ss:$8 sps:$4 sm:$0xff]  }
 0x45e   :  { %2022 = vmatpush1.bf16.msra.mxu1 %v3249_v50  ;;  %v3326_v50 = vld [vmem:[#allocation5 + $0x8d4] ss:$8 sps:$4 sm:$0xff]  }
 0x45f   :  { %2023 = vmatprep.subr.bf16.mxu1 %v3254_v51  ;;  %v3324_v51 = vld [vmem:[#allocation5 + $0x8d0] ss:$8 sps:$4 sm:$0xff]  }
 0x462   :  { %2024 = vmatpush1.bf16.msra.mxu1 %v3252_v52  ;;  %v3329_v52 = vld [vmem:[#allocation5 + $0x8c4] ss:$8 sps:$4 sm:$0xff]  }
 0x463   :  { %2025 = vmatprep.subr.bf16.mxu1 %v3257_v53  ;;  %v3327_v53 = vld [vmem:[#allocation5 + $0x8c0] ss:$8 sps:$4 sm:$0xff]  }
 0x466   :  { %2026 = vmatpush1.bf16.msra.mxu1 %v3255_v54  ;;  %v3332_v54 = vld [vmem:[#allocation5 + $0x8b4] ss:$8 sps:$4 sm:$0xff]  }
 0x467   :  { %2027 = vmatprep.subr.bf16.mxu1 %v3260_v55  ;;  %v3330_v55 = vld [vmem:[#allocation5 + $0x8b0] ss:$8 sps:$4 sm:$0xff]  }
 0x46a   :  { %2028 = vmatpush1.bf16.msra.mxu1 %v3258_v56  ;;  %v3335_v56 = vld [vmem:[#allocation5 + $0x8a4] ss:$8 sps:$4 sm:$0xff]  }
 0x46b   :  { %2029 = vmatprep.subr.bf16.mxu1 %v3263_v57  ;;  %v3333_v57 = vld [vmem:[#allocation5 + $0x8a0] ss:$8 sps:$4 sm:$0xff]  }
 0x46e   :  { %2030 = vmatpush1.bf16.msra.mxu1 %v3261_v58  ;;  %v1596_v58 = vld [vmem:[#allocation7 + $0xc] sm:$0x3] }
 0x46f   :  { %2031 = vmatprep.subr.bf16.mxu1 %v3266_v59  ;;  %v1601_v59 = vrot.slane %v1596_v58, %v3513_v34 }
 0x472   :  { %2032 = vmatpush1.bf16.msra.mxu1 %v3264_v60  ;;  %v1605_v60 = vrot.slane %v1596_v58, %v3515_v36  ;;  %v2098_v58 = vld [vmem:[#allocation7 + $0x10] sm:$0x3] }
 0x473   :  { %2033 = vmatprep.subr.bf16.mxu1 %v3269_v61 }
 0x476   :  { %2034 = vmatpush1.bf16.msra.mxu1 %v3267_v62 }
 0x477   :  { %2035 = vmatprep.subr.bf16.mxu1 %v3272_v63 }
 0x47a   :  { %2036 = vmatpush2.bf16.msra.mxu1 %v3270_v0 }
 0x47b   :  { %2037 = vmatprep.subr.bf16.mxu1 %v3275_v1 }
 0x47e   :  { %2038 = vmatpush2.bf16.msra.mxu1 %v3273_v2 }
 0x47f   :  { %2039 = vmatprep.subr.bf16.mxu1 %v3278_v3 }
 0x482   :  { %2040 = vmatpush2.bf16.msra.mxu1 %v3276_v4 }
 0x483   :  { %2041 = vmatprep.subr.bf16.mxu1 %v3281_v5 }
 0x486   :  { %2042 = vmatpush2.bf16.msra.mxu1 %v3279_v6 }
 0x487   :  { %2043 = vmatprep.subr.bf16.mxu1 %v3284_v7  ;;  %v3338_v7 = vld [vmem:[#allocation5 + $0x894] ss:$8 sps:$4 sm:$0xff]  }
 0x48a   :  { %2044 = vmatpush2.bf16.msra.mxu1 %v3282_v8  ;;  %v3336_v8 = vld [vmem:[#allocation5 + $0x890] ss:$8 sps:$4 sm:$0xff]  }
 0x48b   :  { %2045 = vmatprep.subr.bf16.mxu1 %v3287_v9  ;;  %v3341_v9 = vld [vmem:[#allocation5 + $0x884] ss:$8 sps:$4 sm:$0xff]  }
 0x48e   :  { %2046 = vmatpush2.bf16.msra.mxu1 %v3285_v10  ;;  %v3339_v10 = vld [vmem:[#allocation5 + $0x880] ss:$8 sps:$4 sm:$0xff]  }
 0x48f   :  { %2047 = vmatprep.subr.bf16.mxu1 %v3290_v24  ;;  %v3360_v24 = vld [vmem:[#allocation5 + $0x910] ss:$8 sps:$4 sm:$0xff]  }
 0x492   :  { %2048 = vmatpush2.bf16.msra.mxu1 %v3288_v25  ;;  %v3365_v25 = vld [vmem:[#allocation5 + $0x904] ss:$8 sps:$4 sm:$0xff]  }
 0x493   :  { %2049 = vmatprep.subr.bf16.mxu1 %v3293_v26  ;;  %v3363_v26 = vld [vmem:[#allocation5 + $0x900] ss:$8 sps:$4 sm:$0xff]  }
 0x496   :  { %2050 = vmatpush2.bf16.msra.mxu1 %v3291_v27  ;;  %v3368_v27 = vld [vmem:[#allocation5 + $0x9f4] ss:$8 sps:$4 sm:$0xff]  }
 0x519   :  { %v1551_v14 = vpop.f32.mrf.mxu1 }
 0x51a   :  { %v1552_v15 = vadd.f32 %v1551_v14, %v1350_v12  ;;  %v3344_v12 = vld [vmem:[#allocation5 + $0x974] ss:$8 sps:$4 sm:$0xff]   ;;  %v3345_v14 = vld [vmem:[#allocation5 + $0x960] ss:$8 sps:$4 sm:$0xff]  }
 0x51b   :  { %v1553_v16 = vpop.f32.mrf.mxu1  ;;  %2521 = vmatprep.subr.bf16.mxu1 %v3344_v12 }
 0x51c   :  { %v1554_v17 = vadd.f32 %v1553_v16, %v1354_v13  ;;  %v1558_v18 = vmax.f32 %v1552_v15, 0.0  ;;  %v3347_v13 = vld [vmem:[#allocation5 + $0x964] ss:$8 sps:$4 sm:$0xff]   ;;  %v3350_v15 = vld [vmem:[#allocation5 + $0x954] ss:$8 sps:$4 sm:$0xff]  }
 0x51d   :  { %v1555_v19 = vpop.f32.mrf.mxu1  ;;  %v3348_v16 = vld [vmem:[#allocation5 + $0x950] ss:$8 sps:$4 sm:$0xff]  }
 0x51e   :  { %v1559_v20 = vmax.f32 %v1554_v17, 0.0  ;;  %v1560_v23 = vpack.c.bf16 %v1558_v18, %v1558_v18  ;;  %v3353_v17 = vld [vmem:[#allocation5 + $0x944] ss:$8 sps:$4 sm:$0xff]   ;;  %v3351_v18 = vld [vmem:[#allocation5 + $0x940] ss:$8 sps:$4 sm:$0xff]  }
 0x51f   :  { %v1556_v21 = vpop.f32.mrf.mxu1  ;;  %v3356_v19 = vld [vmem:[#allocation5 + $0x934] ss:$8 sps:$4 sm:$0xff]  }
 0x520   :  { %v1561_v22 = vpack.c.bf16 %v1559_v20, %v1559_v20  ;;  %v3354_v20 = vld [vmem:[#allocation5 + $0x930] ss:$8 sps:$4 sm:$0xff]   ;;  %v3359_v21 = vld [vmem:[#allocation5 + $0x924] ss:$8 sps:$4 sm:$0xff]  }
 0x522   :  { %1800 = vmatprep.mubr.bf16.mxu0 %v1561_v22  ;;  %v3357_v22 = vld [vmem:[#allocation5 + $0x920] ss:$8 sps:$4 sm:$0xff]  }
 0x523   :  { %1801 = vmatmul.mubr.bf16.vlgmr.msra.gmra.mxu0 %v1560_v23  ;;  %v3362_v23 = vld [vmem:[#allocation5 + $0x914] ss:$8 sps:$4 sm:$0xff]  }
 0x524   :  { %2271 = vmatpush1.bf16.msra.mxu0 %v3294_v28  ;;  %v3366_v28 = vld [vmem:[#allocation5 + $0x9f0] ss:$8 sps:$4 sm:$0xff]  }
 0x525   :  { %2272 = vmatprep.subr.bf16.mxu0 %v3299_v30  ;;  %v3369_v30 = vld [vmem:[#allocation5 + $0x9e0] ss:$8 sps:$4 sm:$0xff]  }
 0x528   :  { %2273 = vmatpush1.bf16.msra.mxu0 %v3297_v31  ;;  %v3374_v31 = vld [vmem:[#allocation5 + $0x9d4] ss:$8 sps:$4 sm:$0xff]  }
 0x529   :  { %2274 = vmatprep.subr.bf16.mxu0 %v3302_v32  ;;  %v3372_v32 = vld [vmem:[#allocation5 + $0x9d0] ss:$8 sps:$4 sm:$0xff]  }
 0x52c   :  { %2275 = vmatpush1.bf16.msra.mxu0 %v3300_v33  ;;  %v3377_v33 = vld [vmem:[#allocation5 + $0x9c4] ss:$8 sps:$4 sm:$0xff]  }
 0x52d   :  { %2276 = vmatprep.subr.bf16.mxu0 %v3305_v35  ;;  %v3375_v35 = vld [vmem:[#allocation5 + $0x9c0] ss:$8 sps:$4 sm:$0xff]  }
 0x530   :  { %2277 = vmatpush1.bf16.msra.mxu0 %v3303_v37  ;;  %v3380_v37 = vld [vmem:[#allocation5 + $0x9b4] ss:$8 sps:$4 sm:$0xff]  }
 0x531   :  { %2278 = vmatprep.subr.bf16.mxu0 %v3308_v38  ;;  %v3378_v38 = vld [vmem:[#allocation5 + $0x9b0] ss:$8 sps:$4 sm:$0xff]  }
 0x534   :  { %2279 = vmatpush1.bf16.msra.mxu0 %v3306_v39  ;;  %v3383_v39 = vld [vmem:[#allocation5 + $0x9a4] ss:$8 sps:$4 sm:$0xff]  }
 0x535   :  { %2280 = vmatprep.subr.bf16.mxu0 %v3311_v40  ;;  %v3381_v40 = vld [vmem:[#allocation5 + $0x9a0] ss:$8 sps:$4 sm:$0xff]  }
 0x538   :  { %2281 = vmatpush1.bf16.msra.mxu0 %v3309_v41  ;;  %v1847_v41 = vld [vmem:[#allocation7 + $0xe] sm:$0x3] }
 0x539   :  { %2282 = vmatprep.subr.bf16.mxu0 %v3314_v42  ;;  %v1852_v42 = vrot.slane %v1847_v41, %v3513_v34 }
 0x53c   :  { %2283 = vmatpush1.bf16.msra.mxu0 %v3312_v43  ;;  %v1856_v43 = vrot.slane %v1847_v41, %v3515_v36 }
 0x53d   :  { %2284 = vmatprep.subr.bf16.mxu0 %v3317_v44 }
 0x540   :  { %2285 = vmatpush1.bf16.msra.mxu0 %v3315_v45 }
 0x541   :  { %2286 = vmatprep.subr.bf16.mxu0 %v3320_v46 }
 0x544   :  { %2287 = vmatpush2.bf16.msra.mxu0 %v3318_v47 }
 0x545   :  { %2288 = vmatprep.subr.bf16.mxu0 %v3323_v48 }
 0x548   :  { %2289 = vmatpush2.bf16.msra.mxu0 %v3321_v49 }
 0x549   :  { %2290 = vmatprep.subr.bf16.mxu0 %v3326_v50 }
 0x54c   :  { %2291 = vmatpush2.bf16.msra.mxu0 %v3324_v51 }
 0x54d   :  { %2292 = vmatprep.subr.bf16.mxu0 %v3329_v52 }
 0x550   :  { %2293 = vmatpush2.bf16.msra.mxu0 %v3327_v53 }
 0x551   :  { %2294 = vmatprep.subr.bf16.mxu0 %v3332_v54  ;;  %v3386_v54 = vld [vmem:[#allocation5 + $0x994] ss:$8 sps:$4 sm:$0xff]  }
 0x554   :  { %2295 = vmatpush2.bf16.msra.mxu0 %v3330_v55  ;;  %v3384_v55 = vld [vmem:[#allocation5 + $0x990] ss:$8 sps:$4 sm:$0xff]  }
 0x555   :  { %2296 = vmatprep.subr.bf16.mxu0 %v3335_v56  ;;  %v3389_v56 = vld [vmem:[#allocation5 + $0x984] ss:$8 sps:$4 sm:$0xff]  }
 0x558   :  { %2297 = vmatpush2.bf16.msra.mxu0 %v3333_v57  ;;  %v3387_v57 = vld [vmem:[#allocation5 + $0x980] ss:$8 sps:$4 sm:$0xff]  }
 0x559   :  { %2298 = vmatprep.subr.bf16.mxu0 %v3338_v7  ;;  %v2349_v7 = vld [vmem:[#allocation7 + $0x12] sm:$0x3] }
 0x55c   :  { %2299 = vmatpush2.bf16.msra.mxu0 %v3336_v8  ;;  %v2354_v8 = vrot.slane %v2349_v7, %v3513_v34 }
 0x55d   :  { %2300 = vmatprep.subr.bf16.mxu0 %v3341_v9  ;;  %v2358_v9 = vrot.slane %v2349_v7, %v3515_v36 }
 0x560   :  { %2301 = vmatpush2.bf16.msra.mxu0 %v3339_v10 }
 0x5e3   :  { %v1802_v61 = vpop.f32.mrf.mxu0 }
 0x5e4   :  { %v1803_v62 = vadd.f32 %v1802_v61, %v1601_v59  ;;  %v2103_v59 = vrot.slane %v2098_v58, %v3513_v34 }
 0x5e5   :  { %v1804_v63 = vpop.f32.mrf.mxu0 }
 0x5e6   :  { %v1805_v0 = vadd.f32 %v1804_v63, %v1605_v60  ;;  %v1809_v1 = vmax.f32 %v1803_v62, 0.0  ;;  %v2107_v60 = vrot.slane %v2098_v58, %v3515_v36 }
 0x5e7   :  { %v1806_v2 = vpop.f32.mrf.mxu0 }
 0x5e8   :  { %v1810_v3 = vmax.f32 %v1805_v0, 0.0  ;;  %v1811_v6 = vpack.c.bf16 %v1809_v1, %v1809_v1 }
 0x5e9   :  { %v1807_v4 = vpop.f32.mrf.mxu0 }
 0x5ea   :  { %v1812_v5 = vpack.c.bf16 %v1810_v3, %v1810_v3 }
 0x5ec   :  { %2051 = vmatprep.mubr.bf16.mxu1 %v1812_v5 }
 0x5ed   :  { %2052 = vmatmul.mubr.bf16.vlgmr.msra.gmra.mxu1 %v1811_v6 }
 0x5ee   :  { %2522 = vmatpush1.bf16.msra.mxu1 %v3342_v11 }
 0x5ef   :  { %2523 = vmatprep.subr.bf16.mxu1 %v3347_v13 }
 0x5f2   :  { %2524 = vmatpush1.bf16.msra.mxu1 %v3345_v14 }
 0x5f3   :  { %2525 = vmatprep.subr.bf16.mxu1 %v3350_v15 }
 0x5f6   :  { %2526 = vmatpush1.bf16.msra.mxu1 %v3348_v16 }
 0x5f7   :  { %2527 = vmatprep.subr.bf16.mxu1 %v3353_v17 }
 0x5fa   :  { %2528 = vmatpush1.bf16.msra.mxu1 %v3351_v18 }
 0x5fb   :  { %2529 = vmatprep.subr.bf16.mxu1 %v3356_v19 }
 0x5fe   :  { %2530 = vmatpush1.bf16.msra.mxu1 %v3354_v20 }
 0x5ff   :  { %2531 = vmatprep.subr.bf16.mxu1 %v3359_v21 }
 0x602   :  { %2532 = vmatpush1.bf16.msra.mxu1 %v3357_v22 }
 0x603   :  { %2533 = vmatprep.subr.bf16.mxu1 %v3362_v23 }
 0x606   :  { %2534 = vmatpush1.bf16.msra.mxu1 %v3360_v24 }
 0x607   :  { %2535 = vmatprep.subr.bf16.mxu1 %v3365_v25 }
 0x60a   :  { %2536 = vmatpush1.bf16.msra.mxu1 %v3363_v26 }
 0x60b   :  { %2537 = vmatprep.subr.bf16.mxu1 %v3368_v27 }
 0x60e   :  { %2538 = vmatpush2.bf16.msra.mxu1 %v3366_v28 }
 0x60f   :  { %2539 = vmatprep.subr.bf16.mxu1 %v3371_v29 }
 0x612   :  { %2540 = vmatpush2.bf16.msra.mxu1 %v3369_v30 }
 0x613   :  { %2541 = vmatprep.subr.bf16.mxu1 %v3374_v31 }
 0x616   :  { %2542 = vmatpush2.bf16.msra.mxu1 %v3372_v32 }
 0x617   :  { %2543 = vmatprep.subr.bf16.mxu1 %v3377_v33 }
 0x61a   :  { %2544 = vmatpush2.bf16.msra.mxu1 %v3375_v35 }
 0x61b   :  { %2545 = vmatprep.subr.bf16.mxu1 %v3380_v37 }
 0x61e   :  { %2546 = vmatpush2.bf16.msra.mxu1 %v3378_v38 }
 0x61f   :  { %2547 = vmatprep.subr.bf16.mxu1 %v3383_v39 }
 0x622   :  { %2548 = vmatpush2.bf16.msra.mxu1 %v3381_v40 }
 0x623   :  { %2549 = vmatprep.subr.bf16.mxu1 %v3386_v54 }
 0x626   :  { %2550 = vmatpush2.bf16.msra.mxu1 %v3384_v55 }
 0x627   :  { %2551 = vmatprep.subr.bf16.mxu1 %v3389_v56 }
 0x62a   :  { %2552 = vmatpush2.bf16.msra.mxu1 %v3387_v57 }
 0x6ad   :  { %v2053_v44 = vpop.f32.mrf.mxu1 }
 0x6ae   :  { %v2054_v45 = vadd.f32 %v2053_v44, %v1852_v42 }
 0x6af   :  { %v2055_v46 = vpop.f32.mrf.mxu1 }
 0x6b0   :  { %v2056_v47 = vadd.f32 %v2055_v46, %v1856_v43  ;;  %v2060_v48 = vmax.f32 %v2054_v45, 0.0 }
 0x6b1   :  { %v2057_v49 = vpop.f32.mrf.mxu1 }
 0x6b2   :  { %v2061_v50 = vmax.f32 %v2056_v47, 0.0  ;;  %v2062_v53 = vpack.c.bf16 %v2060_v48, %v2060_v48 }
 0x6b3   :  { %v2058_v51 = vpop.f32.mrf.mxu1 }
 0x6b4   :  { %v2063_v52 = vpack.c.bf16 %v2061_v50, %v2061_v50 }
 0x6b6   :  { %2302 = vmatprep.mubr.bf16.mxu0 %v2063_v52 }
 0x6b7   :  { %2303 = vmatmul.mubr.bf16.vlgmr.msra.gmra.mxu0 %v2062_v53 }
 0x777   :  { %v2304_v61 = vpop.f32.mrf.mxu0 }
 0x778   :  { %v2305_v62 = vadd.f32 %v2304_v61, %v2103_v59 }
 0x779   :  { %v2306_v63 = vpop.f32.mrf.mxu0 }
 0x77a   :  { %v2307_v0 = vadd.f32 %v2306_v63, %v2107_v60  ;;  %v2311_v1 = vmax.f32 %v2305_v62, 0.0 }
 0x77b   :  { %v2308_v2 = vpop.f32.mrf.mxu0 }
 0x77c   :  { %v2312_v3 = vmax.f32 %v2307_v0, 0.0  ;;  %v2313_v6 = vpack.c.bf16 %v2311_v1, %v2311_v1 }
 0x77d   :  { %v2309_v4 = vpop.f32.mrf.mxu0 }
 0x77e   :  { %v2314_v5 = vpack.c.bf16 %v2312_v3, %v2312_v3 }
 0x780   :  { %2553 = vmatprep.mubr.bf16.mxu1 %v2314_v5 }
 0x781   :  { %2554 = vmatmul.mubr.bf16.vlgmr.msra.gmra.mxu1 %v2313_v6 }
 0x841   :  { %v2555_v10 = vpop.f32.mrf.mxu1 }
 0x842   :  { %v2556_v11 = vadd.f32 %v2555_v10, %v2354_v8 }
 0x843   :  { %v2557_v12 = vpop.f32.mrf.mxu1 }
 0x844   :  { %v2562_v13 = vmax.f32 %v2556_v11, 0.0  ;;  %v2558_v14 = vadd.f32 %v2557_v12, %v2358_v9 }
 0x845   :  { %v2559_v15 = vpop.f32.mrf.mxu1 }
 0x846   :  { %2564 = vst [vmem:[#allocation8] sm:$0xff] %v2562_v13  ;;  %v2563_v16 = vmax.f32 %v2558_v14, 0.0 }
 0x847   :  { %v2560_v17 = vpop.f32.mrf.mxu1 }
 0x848   :  { %2565 = vst [vmem:[#allocation8 + $0x8] sm:$0xff] %v2563_v16 }
 0x849   :  { %3461 = shalt.err (!%p3458_p5)
}
 0x84a   :  { %2575 = dma.vmem_to_hbm [thread:$0]  %s2573_s2, 256, %s3543_s3, [#allocation4]  }
 0x84b   :  { %3474 = dma.done.wait [#allocation4], 256  }
 0x84c   :  { %3475 = vsyncadd [#allocation4], 4294967040 }
 0x84d   :  { %2579 = vsyncpa [#allocation3], 1 }
 0x84e   :  { %2580 = vsyncpa [#allocation6], 1 }
 0x84f   :  { %2581 = vsyncpa [#allocation4], 1 }

</bundles_post_ra>
